<compile_context>
chip_gen: v7x
topology: tpu7x:2x2x1
jax: 0.10.0
libtpu: 0.0.40
codegen_flags: <defaults>
</compile_context>

<pallas_src>
import math
import numpy as np
import jax
import jax.numpy as jnp
from jax import lax
from jax.experimental import pallas as pl
from jax.experimental.pallas import tpu as pltpu


# ----------------- Halton edge sampling (trace-time glue, matches PyTorch) -----------------
def _halton(b, n):
    h, d = 0, 1
    seq = []
    for _ in range(n):
        x = d - h
        if x == 1:
            h = 1
            d *= b
        else:
            y = d // b
            while x <= y:
                y //= b
            h = (b + 1) * y - x
        seq.append(h / d)
    return seq


def sample_edges(num_tokens, num_edges, rng):
    """Replicates HaltonEdgeSampler.sample_edges (torch.randint fallback -> seeded numpy)."""
    if num_edges == 0 or num_tokens < 2:
        return np.zeros((0,), np.int64), np.zeros((0,), np.int64)
    h_src = np.asarray(_halton(2, num_edges), dtype=np.float64)
    h_dst = np.asarray(_halton(3, num_edges), dtype=np.float64)
    src = (h_src * num_tokens).astype(np.int64)
    dst = (h_dst * num_tokens).astype(np.int64)
    keep = src != dst
    src, dst = src[keep], dst[keep]
    if len(src) < num_edges:
        # TODO(synk): PyTorch uses unseeded torch.randint here; we use a seeded numpy rng.
        add = num_edges - len(src)
        es = rng.integers(0, num_tokens, size=(add,))
        et = rng.integers(0, num_tokens, size=(add,))
        m = es != et
        src = np.concatenate([src, es[m]])
        dst = np.concatenate([dst, et[m]])
        if len(src) < num_edges:
            num_edges = len(src)
    return src[:num_edges], dst[:num_edges]


# --------------------------------- Pallas kernel ---------------------------------
def _gelu_exact(x):
    # torch nn.GELU() default = exact erf formulation
    return 0.5 * x * (1.0 + lax.erf(x * (1.0 / math.sqrt(2.0))))


def make_tcga_kernel():
    def kernel(x_ref, wq_ref, bq_ref, wk_ref, bk_ref, wv_ref, bv_ref,
               wo_ref, bo_ref, w1q_ref, w1k_ref, b1_ref, w2s_ref, ew_ref,
               hexp_ref, src_col_ref, src_row_ref, dst_col_ref, out_ref):
        xb = x_ref[0]                                                   # (S, D)
        seq_len, _ = xb.shape
        n_edges = src_col_ref.shape[0]

        # --- QKV projections: dense (S,D)@(D,D) on the MXU ---
        q = jnp.dot(xb, wq_ref[...], preferred_element_type=jnp.float32) + bq_ref[...]
        k = jnp.dot(xb, wk_ref[...], preferred_element_type=jnp.float32) + bk_ref[...]
        v = jnp.dot(xb, wv_ref[...], preferred_element_type=jnp.float32) + bv_ref[...]

        # --- Gather / scatter one-hots built in-kernel (VPU iota + compare) ---
        lane_ids = lax.broadcasted_iota(jnp.int32, (n_edges, seq_len), 1)
        gsrc = (lane_ids == src_col_ref[...]).astype(jnp.float32)       # (E, S)
        gdst = (lane_ids == dst_col_ref[...]).astype(jnp.float32)       # (E, S)
        row_ids = lax.broadcasted_iota(jnp.int32, (seq_len, n_edges), 0)
        gsrcT = (row_ids == src_row_ref[...]).astype(jnp.float32)       # (S, E)

        # --- Edge gathers for ALL heads at once: (E,S)@(S,D) ---
        q_src = jnp.dot(gsrc, q, preferred_element_type=jnp.float32)    # (E, D)
        k_dst = jnp.dot(gdst, k, preferred_element_type=jnp.float32)    # (E, D)
        v_dst = jnp.dot(gdst, v, preferred_element_type=jnp.float32)    # (E, D)

        # --- Edge MLP fused across heads (block-diagonal weights) ---
        hidden = (jnp.dot(q_src, w1q_ref[...], preferred_element_type=jnp.float32)
                  + jnp.dot(k_dst, w1k_ref[...], preferred_element_type=jnp.float32)
                  + b1_ref[...])
        hidden = _gelu_exact(hidden)                                     # (E, D)
        # scale is folded into w2s at trace time; b2 dropped (softmax shift-invariance)
        score = jnp.dot(hidden, w2s_ref[...], preferred_element_type=jnp.float32)  # (E, H)

        # --- One softmax over the edge axis for all heads, ew fused into the normalize ---
        m = jnp.max(score, axis=0, keepdims=True)                        # (1, H)
        e = jnp.exp(score - m)                                           # (E, H)
        denom = jnp.sum(e, axis=0, keepdims=True)                        # (1, H)
        attn = e * (pl.reciprocal(denom, approx=True) * ew_ref[...])     # (E, H)

        # --- Expand per-head attn to feature width, weight values, scatter, project ---
        attn_exp = jnp.dot(attn, hexp_ref[...], preferred_element_type=jnp.float32)  # (E, D)
        weighted = attn_exp * v_dst                                      # (E, D)
        scattered = jnp.dot(gsrcT, weighted, preferred_element_type=jnp.float32)     # (S, D)
        out_ref[0] = (jnp.dot(scattered, wo_ref[...], preferred_element_type=jnp.float32)
                      + bo_ref[...])
    return kernel


def tcga_forward(x, params, src_idx, dst_idx):
    B, S, D = x.shape
    H = params["num_heads"]
    hd = D // H
    E = int(src_idx.shape[0])
    scale = hd ** (-0.5)

    # --- trace-time packing (free): block-diagonal edge-MLP weights across heads ---
    eye_h = jnp.eye(H, dtype=jnp.float32)
    w1q_bd = jnp.kron(eye_h, params["w1"][:hd, :])            # (D, D)
    w1k_bd = jnp.kron(eye_h, params["w1"][hd:, :])            # (D, D)
    b1_t = jnp.tile(params["b1"], (1, H))                     # (1, D)
    w2_bd = jnp.kron(eye_h, params["w2"]) * scale             # (D, H)  (scale folded in)
    hexp = jnp.kron(eye_h, jnp.ones((1, hd), jnp.float32))    # (H, D)  head expansion one-hot

    src_col = src_idx.astype(jnp.int32).reshape(E, 1)
    src_row = src_idx.astype(jnp.int32).reshape(1, E)
    dst_col = dst_idx.astype(jnp.int32).reshape(E, 1)

    def full(shape):
        return pl.BlockSpec(shape, lambda b, _n=len(shape): (0,) * _n)

    in_specs = [
        pl.BlockSpec((1, S, D), lambda b: (b, 0, 0)),
        full((D, D)), full((1, D)),                 # q_proj
        full((D, D)), full((1, D)),                 # k_proj
        full((D, D)), full((1, D)),                 # v_proj
        full((D, D)), full((1, D)),                 # o_proj
        full((D, D)), full((D, D)), full((1, D)),   # edge MLP layer 1 (block-diag q/k + bias)
        full((D, H)),                               # edge MLP layer 2 (block-diag, pre-scaled)
        full((1, H)),                               # edge_weight
        full((H, D)),                               # head expansion one-hot
        full((E, 1)), full((1, E)), full((E, 1)),   # src / srcT / dst indices (int32)
    ]
    out_spec = pl.BlockSpec((1, S, D), lambda b: (b, 0, 0))

    return pl.pallas_call(
        make_tcga_kernel(),
        out_shape=jax.ShapeDtypeStruct((B, S, D), jnp.float32),
        grid=(B,),
        in_specs=in_specs,
        out_specs=out_spec,
        compiler_params=pltpu.CompilerParams(dimension_semantics=("parallel",)),
    )(x, params["wq"], params["bq"], params["wk"], params["bk"],
      params["wv"], params["bv"], params["wo"], params["bo"],
      w1q_bd, w1k_bd, b1_t, w2_bd, params["ew"], hexp,
      src_col, src_row, dst_col)


# --------------------------------- pure-JAX reference ---------------------------------
def tcga_reference(x, params, src_idx, dst_idx):
    B, S, D = x.shape
    H = params["num_heads"]
    hd = D // H
    scale = hd ** (-0.5)
    q = x @ params["wq"] + params["bq"][0]
    k = x @ params["wk"] + params["bk"][0]
    v = x @ params["wv"] + params["bv"][0]
    q = q.reshape(B, S, H, hd).transpose(0, 2, 1, 3)
    k = k.reshape(B, S, H, hd).transpose(0, 2, 1, 3)
    v = v.reshape(B, S, H, hd).transpose(0, 2, 1, 3)
    q_src = q[:, :, src_idx]                                             # (B,H,E,hd)
    k_dst = k[:, :, dst_idx]
    ef = jnp.concatenate([q_src, k_dst], axis=-1)
    hidden = jax.nn.gelu(ef @ params["w1"] + params["b1"][0], approximate=False)
    score = hidden @ params["w2"] + params["b2"][0]                      # (B,H,E,1)
    attn = jax.nn.softmax(score * scale, axis=2)
    attn = attn * params["ew"][0][None, :, None, None]
    weighted = attn * v[:, :, dst_idx]
    out = jnp.zeros((B, H, S, hd), jnp.float32).at[:, :, src_idx].add(weighted)
    out = out.transpose(0, 2, 1, 3).reshape(B, S, D)
    return out @ params["wo"] + params["bo"][0]


# --------------------------------------- main ---------------------------------------
if __name__ == "__main__":
    B, S, D, H = 2, 64, 64, 8
    hd = D // H

    # Edge budget: module's non-CUDA branch -> min(500, int(0.01 * S * S)) = 40 edges.
    max_edges = min(500, int(0.01 * S * S))
    rng = np.random.default_rng(0)
    src_np, dst_np = sample_edges(S, max_edges, rng)
    assert src_np.shape[0] > 0, "degenerate: no edges sampled"
    src_idx = jnp.asarray(src_np, jnp.int32)
    dst_idx = jnp.asarray(dst_np, jnp.int32)

    key = jax.random.PRNGKey(0)
    keys = jax.random.split(key, 16)

    def nrm(k, shape, s=0.1):
        return jax.random.normal(k, shape, jnp.float32) * s

    params = dict(
        num_heads=H,
        wq=nrm(keys[0], (D, D)), bq=nrm(keys[1], (1, D)),
        wk=nrm(keys[2], (D, D)), bk=nrm(keys[3], (1, D)),
        wv=nrm(keys[4], (D, D)), bv=nrm(keys[5], (1, D)),
        wo=nrm(keys[6], (D, D)), bo=nrm(keys[7], (1, D)),
        w1=nrm(keys[8], (2 * hd, hd)), b1=nrm(keys[9], (1, hd)),
        w2=nrm(keys[10], (hd, 1)), b2=nrm(keys[11], (1, 1)),   # b2 only used by the reference
        ew=jax.random.normal(keys[12], (1, H), jnp.float32),   # torch.randn(1, H, 1)
    )
    x = jax.random.normal(keys[13], (B, S, D), jnp.float32)

    out = jax.block_until_ready(tcga_forward(x, params, src_idx, dst_idx))
    ref = jax.block_until_ready(tcga_reference(x, params, src_idx, dst_idx))

    assert out.shape == (B, S, D)
    assert np.allclose(np.asarray(out), np.asarray(ref), rtol=1e-2, atol=1e-2), (
        "max abs err = %g" % float(np.max(np.abs(np.asarray(out) - np.asarray(ref)))))
    print("KERNEL_OK")
</pallas_src>

<mosaic_0001>
module attributes {stable_mosaic.version = 11 : i64} {
  func.func @kernel(%arg0: i32, %arg1: memref<1x64x64xf32, #tpu.memory_space<vmem>>, %arg2: memref<64x64xf32, #tpu.memory_space<vmem>>, %arg3: memref<1x64xf32, #tpu.memory_space<vmem>>, %arg4: memref<64x64xf32, #tpu.memory_space<vmem>>, %arg5: memref<1x64xf32, #tpu.memory_space<vmem>>, %arg6: memref<64x64xf32, #tpu.memory_space<vmem>>, %arg7: memref<1x64xf32, #tpu.memory_space<vmem>>, %arg8: memref<64x64xf32, #tpu.memory_space<vmem>>, %arg9: memref<1x64xf32, #tpu.memory_space<vmem>>, %arg10: memref<64x64xf32, #tpu.memory_space<vmem>>, %arg11: memref<64x64xf32, #tpu.memory_space<vmem>>, %arg12: memref<1x64xf32, #tpu.memory_space<vmem>>, %arg13: memref<64x8xf32, #tpu.memory_space<vmem>>, %arg14: memref<1x8xf32, #tpu.memory_space<vmem>>, %arg15: memref<8x64xf32, #tpu.memory_space<vmem>>, %arg16: memref<40x1xi32, #tpu.memory_space<vmem>>, %arg17: memref<1x40xi32, #tpu.memory_space<vmem>>, %arg18: memref<40x1xi32, #tpu.memory_space<vmem>>, %arg19: memref<1x64x64xf32, #tpu.memory_space<vmem>>) attributes {dimension_semantics = [#tpu.dimension_semantics<parallel>], iteration_bounds = array<i64: 2>, scalar_prefetch = 0 : i64, scratch_operands = 0 : i64, tpu.core_type = #tpu.core_type<tc>, window_params = [{transform_indices = @transform_0, window_bounds = array<i64: 1, 64, 64>}, {pipeline_mode = #tpu.pipeline_mode<synchronous>, transform_indices = @transform_1, window_bounds = array<i64: 64, 64>}, {pipeline_mode = #tpu.pipeline_mode<synchronous>, transform_indices = @transform_2, window_bounds = array<i64: 1, 64>}, {pipeline_mode = #tpu.pipeline_mode<synchronous>, transform_indices = @transform_3, window_bounds = array<i64: 64, 64>}, {pipeline_mode = #tpu.pipeline_mode<synchronous>, transform_indices = @transform_4, window_bounds = array<i64: 1, 64>}, {pipeline_mode = #tpu.pipeline_mode<synchronous>, transform_indices = @transform_5, window_bounds = array<i64: 64, 64>}, {pipeline_mode = #tpu.pipeline_mode<synchronous>, transform_indices = @transform_6, window_bounds = array<i64: 1, 64>}, {pipeline_mode = #tpu.pipeline_mode<synchronous>, transform_indices = @transform_7, window_bounds = array<i64: 64, 64>}, {pipeline_mode = #tpu.pipeline_mode<synchronous>, transform_indices = @transform_8, window_bounds = array<i64: 1, 64>}, {pipeline_mode = #tpu.pipeline_mode<synchronous>, transform_indices = @transform_9, window_bounds = array<i64: 64, 64>}, {pipeline_mode = #tpu.pipeline_mode<synchronous>, transform_indices = @transform_10, window_bounds = array<i64: 64, 64>}, {pipeline_mode = #tpu.pipeline_mode<synchronous>, transform_indices = @transform_11, window_bounds = array<i64: 1, 64>}, {pipeline_mode = #tpu.pipeline_mode<synchronous>, transform_indices = @transform_12, window_bounds = array<i64: 64, 8>}, {pipeline_mode = #tpu.pipeline_mode<synchronous>, transform_indices = @transform_13, window_bounds = array<i64: 1, 8>}, {pipeline_mode = #tpu.pipeline_mode<synchronous>, transform_indices = @transform_14, window_bounds = array<i64: 8, 64>}, {pipeline_mode = #tpu.pipeline_mode<synchronous>, transform_indices = @transform_15, window_bounds = array<i64: 40, 1>}, {pipeline_mode = #tpu.pipeline_mode<synchronous>, transform_indices = @transform_16, window_bounds = array<i64: 1, 40>}, {pipeline_mode = #tpu.pipeline_mode<synchronous>, transform_indices = @transform_17, window_bounds = array<i64: 40, 1>}, {transform_indices = @transform_18, window_bounds = array<i64: 1, 64, 64>}]} {
    %c0 = arith.constant 0 : index
    %c0_0 = arith.constant 0 : index
    %c0_1 = arith.constant 0 : index
    %0 = vector.load %arg1[%c0, %c0_0, %c0_1] : memref<1x64x64xf32, #tpu.memory_space<vmem>>, vector<1x64x64xf32>
    %1 = vector.shape_cast %0 : vector<1x64x64xf32> to vector<64x64xf32>
    %c0_2 = arith.constant 0 : index
    %c0_3 = arith.constant 0 : index
    %2 = vector.load %arg2[%c0_2, %c0_3] : memref<64x64xf32, #tpu.memory_space<vmem>>, vector<64x64xf32>
    %cst = arith.constant dense<0.000000e+00> : vector<64x64xf32>
    %3 = tpu.matmul %1, %2, %cst {dimension_numbers = #tpu.dot_dimension_numbers<[1], [0], [0], [1], [0, 0, 1, 1], [], []>} : vector<64x64xf32>, vector<64x64xf32>, vector<64x64xf32> -> vector<64x64xf32>
    %c0_4 = arith.constant 0 : index
    %c0_5 = arith.constant 0 : index
    %4 = vector.load %arg3[%c0_4, %c0_5] : memref<1x64xf32, #tpu.memory_space<vmem>>, vector<1x64xf32>
    %5 = vector.broadcast %4 : vector<1x64xf32> to vector<64x64xf32>
    %6 = arith.addf %3, %5 : vector<64x64xf32>
    %c0_6 = arith.constant 0 : index
    %c0_7 = arith.constant 0 : index
    %7 = vector.load %arg4[%c0_6, %c0_7] : memref<64x64xf32, #tpu.memory_space<vmem>>, vector<64x64xf32>
    %cst_8 = arith.constant dense<0.000000e+00> : vector<64x64xf32>
    %8 = tpu.matmul %1, %7, %cst_8 {dimension_numbers = #tpu.dot_dimension_numbers<[1], [0], [0], [1], [0, 0, 1, 1], [], []>} : vector<64x64xf32>, vector<64x64xf32>, vector<64x64xf32> -> vector<64x64xf32>
    %c0_9 = arith.constant 0 : index
    %c0_10 = arith.constant 0 : index
    %9 = vector.load %arg5[%c0_9, %c0_10] : memref<1x64xf32, #tpu.memory_space<vmem>>, vector<1x64xf32>
    %10 = vector.broadcast %9 : vector<1x64xf32> to vector<64x64xf32>
    %11 = arith.addf %8, %10 : vector<64x64xf32>
    %c0_11 = arith.constant 0 : index
    %c0_12 = arith.constant 0 : index
    %12 = vector.load %arg6[%c0_11, %c0_12] : memref<64x64xf32, #tpu.memory_space<vmem>>, vector<64x64xf32>
    %cst_13 = arith.constant dense<0.000000e+00> : vector<64x64xf32>
    %13 = tpu.matmul %1, %12, %cst_13 {dimension_numbers = #tpu.dot_dimension_numbers<[1], [0], [0], [1], [0, 0, 1, 1], [], []>} : vector<64x64xf32>, vector<64x64xf32>, vector<64x64xf32> -> vector<64x64xf32>
    %c0_14 = arith.constant 0 : index
    %c0_15 = arith.constant 0 : index
    %14 = vector.load %arg7[%c0_14, %c0_15] : memref<1x64xf32, #tpu.memory_space<vmem>>, vector<1x64xf32>
    %15 = vector.broadcast %14 : vector<1x64xf32> to vector<64x64xf32>
    %16 = arith.addf %13, %15 : vector<64x64xf32>
    %17 = tpu.iota {dimensions = array<i32: 1>} : vector<40x64xi32>
    %c0_16 = arith.constant 0 : index
    %c0_17 = arith.constant 0 : index
    %18 = vector.load %arg16[%c0_16, %c0_17] : memref<40x1xi32, #tpu.memory_space<vmem>>, vector<40x1xi32>
    %19 = vector.broadcast %18 : vector<40x1xi32> to vector<40x64xi32>
    %20 = arith.cmpi eq, %17, %19 : vector<40x64xi32>
    %21 = arith.extui %20 : vector<40x64xi1> to vector<40x64xi32>
    %22 = arith.sitofp %21 : vector<40x64xi32> to vector<40x64xf32>
    %c0_18 = arith.constant 0 : index
    %c0_19 = arith.constant 0 : index
    %23 = vector.load %arg18[%c0_18, %c0_19] : memref<40x1xi32, #tpu.memory_space<vmem>>, vector<40x1xi32>
    %24 = vector.broadcast %23 : vector<40x1xi32> to vector<40x64xi32>
    %25 = arith.cmpi eq, %17, %24 : vector<40x64xi32>
    %26 = arith.extui %25 : vector<40x64xi1> to vector<40x64xi32>
    %27 = arith.sitofp %26 : vector<40x64xi32> to vector<40x64xf32>
    %28 = tpu.iota {dimensions = array<i32: 0>} : vector<64x40xi32>
    %c0_20 = arith.constant 0 : index
    %c0_21 = arith.constant 0 : index
    %29 = vector.load %arg17[%c0_20, %c0_21] : memref<1x40xi32, #tpu.memory_space<vmem>>, vector<1x40xi32>
    %30 = vector.broadcast %29 : vector<1x40xi32> to vector<64x40xi32>
    %31 = arith.cmpi eq, %28, %30 : vector<64x40xi32>
    %32 = arith.extui %31 : vector<64x40xi1> to vector<64x40xi32>
    %33 = arith.sitofp %32 : vector<64x40xi32> to vector<64x40xf32>
    %cst_22 = arith.constant dense<0.000000e+00> : vector<40x64xf32>
    %34 = tpu.matmul %22, %6, %cst_22 {dimension_numbers = #tpu.dot_dimension_numbers<[1], [0], [0], [1], [0, 0, 1, 1], [], []>} : vector<40x64xf32>, vector<64x64xf32>, vector<40x64xf32> -> vector<40x64xf32>
    %cst_23 = arith.constant dense<0.000000e+00> : vector<40x64xf32>
    %35 = tpu.matmul %27, %11, %cst_23 {dimension_numbers = #tpu.dot_dimension_numbers<[1], [0], [0], [1], [0, 0, 1, 1], [], []>} : vector<40x64xf32>, vector<64x64xf32>, vector<40x64xf32> -> vector<40x64xf32>
    %cst_24 = arith.constant dense<0.000000e+00> : vector<40x64xf32>
    %36 = tpu.matmul %27, %16, %cst_24 {dimension_numbers = #tpu.dot_dimension_numbers<[1], [0], [0], [1], [0, 0, 1, 1], [], []>} : vector<40x64xf32>, vector<64x64xf32>, vector<40x64xf32> -> vector<40x64xf32>
    %c0_25 = arith.constant 0 : index
    %c0_26 = arith.constant 0 : index
    %37 = vector.load %arg10[%c0_25, %c0_26] : memref<64x64xf32, #tpu.memory_space<vmem>>, vector<64x64xf32>
    %cst_27 = arith.constant dense<0.000000e+00> : vector<40x64xf32>
    %38 = tpu.matmul %34, %37, %cst_27 {dimension_numbers = #tpu.dot_dimension_numbers<[1], [0], [0], [1], [0, 0, 1, 1], [], []>} : vector<40x64xf32>, vector<64x64xf32>, vector<40x64xf32> -> vector<40x64xf32>
    %c0_28 = arith.constant 0 : index
    %c0_29 = arith.constant 0 : index
    %39 = vector.load %arg11[%c0_28, %c0_29] : memref<64x64xf32, #tpu.memory_space<vmem>>, vector<64x64xf32>
    %cst_30 = arith.constant dense<0.000000e+00> : vector<40x64xf32>
    %40 = tpu.matmul %35, %39, %cst_30 {dimension_numbers = #tpu.dot_dimension_numbers<[1], [0], [0], [1], [0, 0, 1, 1], [], []>} : vector<40x64xf32>, vector<64x64xf32>, vector<40x64xf32> -> vector<40x64xf32>
    %41 = arith.addf %38, %40 : vector<40x64xf32>
    %c0_31 = arith.constant 0 : index
    %c0_32 = arith.constant 0 : index
    %42 = vector.load %arg12[%c0_31, %c0_32] : memref<1x64xf32, #tpu.memory_space<vmem>>, vector<1x64xf32>
    %43 = vector.broadcast %42 : vector<1x64xf32> to vector<40x64xf32>
    %44 = arith.addf %41, %43 : vector<40x64xf32>
    %cst_33 = arith.constant 5.000000e-01 : f32
    %45 = vector.broadcast %cst_33 : f32 to vector<40x64xf32>
    %46 = arith.mulf %45, %44 : vector<40x64xf32>
    %cst_34 = arith.constant 0.707106769 : f32
    %47 = vector.broadcast %cst_34 : f32 to vector<40x64xf32>
    %48 = arith.mulf %44, %47 : vector<40x64xf32>
    %49 = math.erf %48 : vector<40x64xf32>
    %cst_35 = arith.constant 1.000000e+00 : f32
    %50 = vector.broadcast %cst_35 : f32 to vector<40x64xf32>
    %51 = arith.addf %50, %49 : vector<40x64xf32>
    %52 = arith.mulf %46, %51 : vector<40x64xf32>
    %c0_36 = arith.constant 0 : index
    %c0_37 = arith.constant 0 : index
    %53 = vector.load %arg13[%c0_36, %c0_37] : memref<64x8xf32, #tpu.memory_space<vmem>>, vector<64x8xf32>
    %cst_38 = arith.constant dense<0.000000e+00> : vector<40x8xf32>
    %54 = tpu.matmul %52, %53, %cst_38 {dimension_numbers = #tpu.dot_dimension_numbers<[1], [0], [0], [1], [0, 0, 1, 1], [], []>} : vector<40x64xf32>, vector<64x8xf32>, vector<40x8xf32> -> vector<40x8xf32>
    %cst_39 = arith.constant dense<0xFF800000> : vector<8xf32>
    %55 = vector.multi_reduction <maximumf>, %54, %cst_39 [0] : vector<40x8xf32> to vector<8xf32>
    %56 = vector.shape_cast %55 : vector<8xf32> to vector<1x8xf32>
    %57 = vector.broadcast %56 : vector<1x8xf32> to vector<40x8xf32>
    %58 = arith.subf %54, %57 : vector<40x8xf32>
    %59 = math.exp %58 : vector<40x8xf32>
    %cst_40 = arith.constant dense<0.000000e+00> : vector<8xf32>
    %60 = vector.multi_reduction <add>, %59, %cst_40 [0] : vector<40x8xf32> to vector<8xf32>
    %61 = vector.shape_cast %60 : vector<8xf32> to vector<1x8xf32>
    %62 = tpu.reciprocal %61 {approx = true} : vector<1x8xf32> -> vector<1x8xf32>
    %c0_41 = arith.constant 0 : index
    %c0_42 = arith.constant 0 : index
    %63 = vector.load %arg14[%c0_41, %c0_42] : memref<1x8xf32, #tpu.memory_space<vmem>>, vector<1x8xf32>
    %64 = arith.mulf %62, %63 : vector<1x8xf32>
    %65 = vector.broadcast %64 : vector<1x8xf32> to vector<40x8xf32>
    %66 = arith.mulf %59, %65 : vector<40x8xf32>
    %c0_43 = arith.constant 0 : index
    %c0_44 = arith.constant 0 : index
    %67 = vector.load %arg15[%c0_43, %c0_44] : memref<8x64xf32, #tpu.memory_space<vmem>>, vector<8x64xf32>
    %cst_45 = arith.constant dense<0.000000e+00> : vector<40x64xf32>
    %68 = tpu.matmul %66, %67, %cst_45 {dimension_numbers = #tpu.dot_dimension_numbers<[1], [0], [0], [1], [0, 0, 1, 1], [], []>} : vector<40x8xf32>, vector<8x64xf32>, vector<40x64xf32> -> vector<40x64xf32>
    %69 = arith.mulf %68, %36 : vector<40x64xf32>
    %cst_46 = arith.constant dense<0.000000e+00> : vector<64x64xf32>
    %70 = tpu.matmul %33, %69, %cst_46 {dimension_numbers = #tpu.dot_dimension_numbers<[1], [0], [0], [1], [0, 0, 1, 1], [], []>} : vector<64x40xf32>, vector<40x64xf32>, vector<64x64xf32> -> vector<64x64xf32>
    %c0_47 = arith.constant 0 : index
    %c0_48 = arith.constant 0 : index
    %71 = vector.load %arg8[%c0_47, %c0_48] : memref<64x64xf32, #tpu.memory_space<vmem>>, vector<64x64xf32>
    %cst_49 = arith.constant dense<0.000000e+00> : vector<64x64xf32>
    %72 = tpu.matmul %70, %71, %cst_49 {dimension_numbers = #tpu.dot_dimension_numbers<[1], [0], [0], [1], [0, 0, 1, 1], [], []>} : vector<64x64xf32>, vector<64x64xf32>, vector<64x64xf32> -> vector<64x64xf32>
    %c0_50 = arith.constant 0 : index
    %c0_51 = arith.constant 0 : index
    %73 = vector.load %arg9[%c0_50, %c0_51] : memref<1x64xf32, #tpu.memory_space<vmem>>, vector<1x64xf32>
    %74 = vector.broadcast %73 : vector<1x64xf32> to vector<64x64xf32>
    %75 = arith.addf %72, %74 : vector<64x64xf32>
    %c0_52 = arith.constant 0 : index
    %c0_53 = arith.constant 0 : index
    %c0_54 = arith.constant 0 : index
    %76 = vector.load %arg19[%c0_52, %c0_53, %c0_54] : memref<1x64x64xf32, #tpu.memory_space<vmem>>, vector<1x64x64xf32>
    %77 = vector.shape_cast %76 : vector<1x64x64xf32> to vector<64x64xf32>
    %78 = vector.shape_cast %75 : vector<64x64xf32> to vector<1x64x64xf32>
    tpu.vector_store %arg19[%c0_52, %c0_53, %c0_54], %78 {strides = array<i32>} : memref<1x64x64xf32, #tpu.memory_space<vmem>>, vector<1x64x64xf32>,
    return
  }
  func.func @transform_0(%arg0: i32) -> (i32, i32, i32) {
    %c0_i32 = arith.constant 0 : i32
    %c0_i32_0 = arith.constant 0 : i32
    %c0_i32_1 = arith.constant 0 : i32
    return %arg0, %c0_i32, %c0_i32_0 : i32, i32, i32
  }
  func.func @transform_1(%arg0: i32) -> (i32, i32) {
    %c0_i32 = arith.constant 0 : i32
    %c0_i32_0 = arith.constant 0 : i32
    %c0_i32_1 = arith.constant 0 : i32
    return %c0_i32, %c0_i32_0 : i32, i32
  }
  func.func @transform_2(%arg0: i32) -> (i32, i32) {
    %c0_i32 = arith.constant 0 : i32
    %c0_i32_0 = arith.constant 0 : i32
    %c0_i32_1 = arith.constant 0 : i32
    return %c0_i32, %c0_i32_0 : i32, i32
  }
  func.func @transform_3(%arg0: i32) -> (i32, i32) {
    %c0_i32 = arith.constant 0 : i32
    %c0_i32_0 = arith.constant 0 : i32
    %c0_i32_1 = arith.constant 0 : i32
    return %c0_i32, %c0_i32_0 : i32, i32
  }
  func.func @transform_4(%arg0: i32) -> (i32, i32) {
    %c0_i32 = arith.constant 0 : i32
    %c0_i32_0 = arith.constant 0 : i32
    %c0_i32_1 = arith.constant 0 : i32
    return %c0_i32, %c0_i32_0 : i32, i32
  }
  func.func @transform_5(%arg0: i32) -> (i32, i32) {
    %c0_i32 = arith.constant 0 : i32
    %c0_i32_0 = arith.constant 0 : i32
    %c0_i32_1 = arith.constant 0 : i32
    return %c0_i32, %c0_i32_0 : i32, i32
  }
  func.func @transform_6(%arg0: i32) -> (i32, i32) {
    %c0_i32 = arith.constant 0 : i32
    %c0_i32_0 = arith.constant 0 : i32
    %c0_i32_1 = arith.constant 0 : i32
    return %c0_i32, %c0_i32_0 : i32, i32
  }
  func.func @transform_7(%arg0: i32) -> (i32, i32) {
    %c0_i32 = arith.constant 0 : i32
    %c0_i32_0 = arith.constant 0 : i32
    %c0_i32_1 = arith.constant 0 : i32
    return %c0_i32, %c0_i32_0 : i32, i32
  }
  func.func @transform_8(%arg0: i32) -> (i32, i32) {
    %c0_i32 = arith.constant 0 : i32
    %c0_i32_0 = arith.constant 0 : i32
    %c0_i32_1 = arith.constant 0 : i32
    return %c0_i32, %c0_i32_0 : i32, i32
  }
  func.func @transform_9(%arg0: i32) -> (i32, i32) {
    %c0_i32 = arith.constant 0 : i32
    %c0_i32_0 = arith.constant 0 : i32
    %c0_i32_1 = arith.constant 0 : i32
    return %c0_i32, %c0_i32_0 : i32, i32
  }
  func.func @transform_10(%arg0: i32) -> (i32, i32) {
    %c0_i32 = arith.constant 0 : i32
    %c0_i32_0 = arith.constant 0 : i32
    %c0_i32_1 = arith.constant 0 : i32
    return %c0_i32, %c0_i32_0 : i32, i32
  }
  func.func @transform_11(%arg0: i32) -> (i32, i32) {
    %c0_i32 = arith.constant 0 : i32
    %c0_i32_0 = arith.constant 0 : i32
    %c0_i32_1 = arith.constant 0 : i32
    return %c0_i32, %c0_i32_0 : i32, i32
  }
  func.func @transform_12(%arg0: i32) -> (i32, i32) {
    %c0_i32 = arith.constant 0 : i32
    %c0_i32_0 = arith.constant 0 : i32
    %c0_i32_1 = arith.constant 0 : i32
    return %c0_i32, %c0_i32_0 : i32, i32
  }
  func.func @transform_13(%arg0: i32) -> (i32, i32) {
    %c0_i32 = arith.constant 0 : i32
    %c0_i32_0 = arith.constant 0 : i32
    %c0_i32_1 = arith.constant 0 : i32
    return %c0_i32, %c0_i32_0 : i32, i32
  }
  func.func @transform_14(%arg0: i32) -> (i32, i32) {
    %c0_i32 = arith.constant 0 : i32
    %c0_i32_0 = arith.constant 0 : i32
    %c0_i32_1 = arith.constant 0 : i32
    return %c0_i32, %c0_i32_0 : i32, i32
  }
  func.func @transform_15(%arg0: i32) -> (i32, i32) {
    %c0_i32 = arith.constant 0 : i32
    %c0_i32_0 = arith.constant 0 : i32
    %c0_i32_1 = arith.constant 0 : i32
    return %c0_i32, %c0_i32_0 : i32, i32
  }
  func.func @transform_16(%arg0: i32) -> (i32, i32) {
    %c0_i32 = arith.constant 0 : i32
    %c0_i32_0 = arith.constant 0 : i32
    %c0_i32_1 = arith.constant 0 : i32
    return %c0_i32, %c0_i32_0 : i32, i32
  }
  func.func @transform_17(%arg0: i32) -> (i32, i32) {
    %c0_i32 = arith.constant 0 : i32
    %c0_i32_0 = arith.constant 0 : i32
    %c0_i32_1 = arith.constant 0 : i32
    return %c0_i32, %c0_i32_0 : i32, i32
  }
  func.func @transform_18(%arg0: i32) -> (i32, i32, i32) {
    %c0_i32 = arith.constant 0 : i32
    %c0_i32_0 = arith.constant 0 : i32
    %c0_i32_1 = arith.constant 0 : i32
    return %arg0, %c0_i32, %c0_i32_0 : i32, i32, i32
  }
}

</mosaic_0001>

<bundles_post_ra>
// kernel: tpu_custom_call.1
= control target key start
LH: loop header
LB: loop body
LE: loop exit
PB: predicated region body
PF: predicated region fallthrough
CT: control target
= control target key end

     0   :  { %s4349_s0 = inlined_call_operand.vmem [shape: f32[2,64,64], index: 0, kind: input, shape index: {}]   ;;  %s4350_s1 = inlined_call_operand.hbm [shape: f32[64,64], index: 1, kind: input, shape index: {}]   ;;  %s4351_s2 = inlined_call_operand.vmem [shape: f32[1,64], index: 2, kind: input, shape index: {}]   ;;  %s4352_s3 = inlined_call_operand.hbm [shape: f32[64,64], index: 3, kind: input, shape index: {}]   ;;  %s4353_s4 = inlined_call_operand.vmem [shape: f32[1,64], index: 4, kind: input, shape index: {}]   ;;  %s4354_s5 = inlined_call_operand.hbm [shape: f32[64,64], index: 5, kind: input, shape index: {}]   ;;  %s4355_s6 = inlined_call_operand.vmem [shape: f32[1,64], index: 6, kind: input, shape index: {}]   ;;  %s4356_s7 = inlined_call_operand.hbm [shape: f32[64,64], index: 7, kind: input, shape index: {}]   ;;  %s4357_s8 = inlined_call_operand.vmem [shape: f32[1,64], index: 8, kind: input, shape index: {}]   ;;  %s4358_s9 = inlined_call_operand.hbm [shape: f32[64,64], index: 9, kind: input, shape index: {}]   ;;  %s4359_s10 = inlined_call_operand.hbm [shape: f32[64,64], index: 10, kind: input, shape index: {}]   ;;  %s4360_s11 = inlined_call_operand.vmem [shape: f32[1,64], index: 11, kind: input, shape index: {}]   ;;  %s4361_s12 = inlined_call_operand.vmem [shape: f32[64,8], index: 12, kind: input, shape index: {}]   ;;  %s4362_s13 = inlined_call_operand.vmem [shape: f32[1,8], index: 13, kind: input, shape index: {}]   ;;  %s4363_s14 = inlined_call_operand.vmem [shape: f32[8,64], index: 14, kind: input, shape index: {}]   ;;  %s4364_s15 = inlined_call_operand.vmem [shape: s32[40,1], index: 15, kind: input, shape index: {}]   ;;  %s4365_s16 = inlined_call_operand.vmem [shape: s32[1,40], index: 16, kind: input, shape index: {}]   ;;  %s4366_s17 = inlined_call_operand.vmem [shape: s32[40,1], index: 17, kind: input, shape index: {}]   ;;  %s4367_s18 = inlined_call_operand.hbm [shape: f32[2,64,64], index: 18, kind: output, shape index: {}]  }
   0x1   :  { %4383 = sst [smem:[#allocation27_spill]] %s4349_s0 }
   0x2   :  { %4384 = sst [smem:[#allocation28_spill]] %s4350_s1 }
   0x3   :  { %4385 = sst [smem:[#allocation29_spill]] %s4351_s2 }
   0x4   :  { %4386 = sst [smem:[#allocation30_spill]] %s4352_s3 }
   0x5   :  { %4387 = sst [smem:[#allocation31_spill]] %s4356_s7 }
   0x6   :  { %4388 = sst [smem:[#allocation32_spill]] %s4357_s8 }
   0x7   :  { %4389 = sst [smem:[#allocation33_spill]] %s4365_s16 }
   0x8   :  { %4390 = sst [smem:[#allocation34_spill]] %s4367_s18 }
   0x9   :  { %23 = vsyncpa [#allocation3], 0 }
   0xa   :  { %24 = vsyncpa [#allocation6], 0 }
   0xb   :  { %25 = vsyncpa [#allocation9], 0 }
   0xc   :  { %26 = vsyncpa [#allocation12], 0 }
   0xd   :  { %27 = vsyncpa [#allocation4], 0 }
   0xe   :  { %29 = vsyncpa [#allocation4 + $0x1], 0  ;;  %s3685_s27 = smov 0   ;;  %s3687_s28 = smov 0  }
   0xf   :  { %s3689_s29 = smov 0   ;;  %s3691_s30 = smov 0  }
  0x10 LB: > { %4391 = sst [smem:[#allocation19_spill]] %s3561_s27  ;;  %s3706_s0 = sadd.s32 4294967295, %s3573_s30   ;;  %s3573_s30 = sphi %s3691_s30, %s4428_s30   ;;  %s3569_s29 = sphi %s3689_s29, %s4431_s29   ;;  %s3565_s28 = sphi %s3687_s28, %s4430_s28   ;;  %s3561_s27 = sphi %s3685_s27, %s4429_s27  }
  0x11   : > { %4392 = sst [smem:[#allocation20_spill]] %s3565_s28  ;;  %s2428_s19 = sadd.s32 4294967294, %s3573_s30  }
  0x12   : > { %4393 = sst [smem:[#allocation21_spill]] %s3569_s29  ;;  %s3710_s1 = sadd.s32 1, %s3573_s30  }
  0x13   : > { %4394 = sst [smem:[#allocation22_spill]] %s3573_s30  ;;  %s425_s20 = sadd.s32 1, %s3569_s29 }
  0x14   : > { %4395 = sst [smem:[#allocation23_spill]] %s3710_s1  ;;  %s422_s21 = ssub.s32 %s3573_s30, %s3710_s1 }
  0x15   : > { %p435_p0 = scmp.ne.s32.totalorder %s3569_s29, %s3565_s28  ;;  %p423_p1 = scmp.eq.s32.totalorder %s422_s21, 0 }
  0x16   : > { %p436_p2 = scmp.eq.s32.totalorder %s3706_s0, 1  ;;  %p441_p3 = scmp.ne.s32.totalorder %s3565_s28, %s3561_s27 }
  0x17   : > { %p442_p4 = scmp.eq.s32.totalorder %s2428_s19, 1  ;;  %p2429_p7 = scmp.ge.s32.totalorder %s3573_s30, 1 }
  0x18   : > { %s3721_s22 = scalar_select %p423_p1, %s3569_s29, %s425_s20  }
  0x19   : > { %p3723_p5 = por %p436_p2, %p435_p0  ;;  %p3727_p6 = por %p442_p4, %p441_p3 }
  0x1a   : > { %4396 = sst [smem:[#allocation24_spill]] %s3721_s22  ;;  %p449_p8 = scmp.lt.s32.totalorder %s3573_s30, 3 }
  0x1b   : > { %s4397_s2 = scalar_select %p3723_p5, 1, 0 }
  0x1c   : > { %s4399_s23 = scalar_select %p3727_p6, 1, 0 }
  0x1d   : > { %4398 = sst [smem:[#allocation25_spill]] %s4397_s2  ;;  %p4376_p9 = scmp.eq.s32.totalorder %s3706_s0, 0 }
  0x1e   : > { %4400 = sst [smem:[#allocation26_spill]] %s4399_s23  ;;  %p3734_p10 = pnand %p2429_p7, %p449_p8 }
  0x1f   : > { %s3575_s25 = smov [#allocation5]   ;;  %s3576_s20 = smov [#allocation8]  }
  0x20   : > { %s4401_s24 = scalar_select %p3734_p10, 1, 0 }
  0x21   : > { %p3221_p11 = pneg %p3734_p10  ;;  %s477_s26 = sshll.u32 %s3575_s25, 4  ;;  %s3740_s26 = int_to_ptr.vmem [resolvable:$true] %s477_s26 }
  0x22   : > { %s509_s21 = sshll.u32 %s3576_s20, 4  ;;  %s3577_s22 = smov [#allocation2]   ;;  %s3748_s21 = int_to_ptr.vmem [resolvable:$true] %s509_s21 }
  0x23   : > { %p3744_p12 = pnand %p4376_p9, %p3221_p11  ;;  %s3750_s29 = sshll.u32 %s3577_s22, 4  ;;  %s462_s29 = int_to_ptr.vmem [resolvable:$true] %s3750_s29 }
  0x24   : > { %s4403_s3 = sld [smem:[#allocation30_spill]] }
  0x25   : > { %p3760_p0 = pneg %p3744_p12 }
  0x2a   : > { %s3327_s27 = scalar_lea.hbm %s4403_s3, 1024 }
  0x2b   : > { %p3328_p13 = scmp.ne.s32.totalorder %s4403_s3, %s3327_s27  ;;  %p3334_p3 = scmp.lt.u32.totalorder %s3327_s27, %s4403_s3 }
  0x2d   : > { %p3330_p1 = pnand %p3760_p0, %p3328_p13 }
  0x2f   : > { %p3331_p2 = pneg %p3330_p1 }
  0x31   : > { %p3336_p4 = pnand %p3334_p3, %p3331_p2 }
  0x33   : > { %3339 = shalt.err (!%p3336_p4)
}
  0x34   : > { %s3340_s30 = scalar_lea.vmem %s3740_s26, 1024  ;;  %p3348_p9 = scmp.lt.s32.totalorder %s3740_s26, %s3740_s26 }
  0x35   : > { %p3341_p7 = scmp.ne.s32.totalorder %s3740_s26, %s3340_s30  ;;  %p3349_p6 = scmp.lt.s32.totalorder %s3340_s30, %s3340_s30 }
  0x37   : > { %p3343_p8 = pnand %p3341_p7, %p3760_p0  ;;  %p3350_p13 = por %p3349_p6, %p3348_p9 }
  0x39   : > { %p3344_p11 = pneg %p3343_p8 }
  0x3b   : > { %p3351_p1 = pnand %p3350_p13, %p3344_p11 }
  0x3d   : > { %3354 = shalt.err (!%p3351_p1)
}
  0x3e   : > { %s3578_s1 = smov 128   ;;  %s3579_s27 = smov 8  }
  0x3f   : > { %3227 = dma.hbm_to_vmem [thread:$0]  (!%p3744_p12), %s4403_s3, 1024, %s3740_s26, [#allocation6], %s3578_s1, %s3578_s1, %s3579_s27  }
  0x40   : > { %s4405_s7 = sld [smem:[#allocation31_spill]] }
  0x46   : > { %s3355_s30 = scalar_lea.hbm %s4405_s7, 1024 }
  0x47   : > { %p3356_p6 = scmp.ne.s32.totalorder %s4405_s7, %s3355_s30  ;;  %p3362_p3 = scmp.lt.u32.totalorder %s3355_s30, %s4405_s7 }
  0x49   : > { %p3358_p9 = pnand %p3356_p6, %p3760_p0 }
  0x4b   : > { %p3359_p2 = pneg %p3358_p9 }
  0x4d   : > { %p3364_p4 = pnand %p3362_p3, %p3359_p2 }
  0x4f   : > { %3367 = shalt.err (!%p3364_p4)
}
  0x50   : > { %s3368_s26 = scalar_lea.vmem %s3748_s21, 1024  ;;  %p3376_p13 = scmp.lt.s32.totalorder %s3748_s21, %s3748_s21 }
  0x51   : > { %p3369_p7 = scmp.ne.s32.totalorder %s3748_s21, %s3368_s26  ;;  %p3377_p1 = scmp.lt.s32.totalorder %s3368_s26, %s3368_s26 }
  0x53   : > { %p3371_p8 = pnand %p3369_p7, %p3760_p0  ;;  %p3378_p6 = por %p3377_p1, %p3376_p13 }
  0x55   : > { %p3372_p11 = pneg %p3371_p8 }
  0x57   : > { %p3379_p9 = pnand %p3378_p6, %p3372_p11 }
  0x59   : > { %3382 = shalt.err (!%p3379_p9)
}
  0x5a   : > { %3233 = dma.hbm_to_vmem [thread:$0]  (!%p3744_p12), %s4405_s7, 1024, %s3748_s21, [#allocation9], %s3578_s1, %s3578_s1, %s3579_s27  }
  0x5b   : > { %s4406_s23 = sld [smem:[#allocation28_spill]] }
  0x61   : > { %s3383_s25 = scalar_lea.hbm %s4406_s23, 1024 }
  0x62   : > { %p3384_p2 = scmp.ne.s32.totalorder %s4406_s23, %s3383_s25  ;;  %p3390_p7 = scmp.lt.u32.totalorder %s3383_s25, %s4406_s23 }
  0x64   : > { %p3386_p3 = pnand %p3384_p2, %p3760_p0 }
  0x66   : > { %p3387_p4 = pneg %p3386_p3 }
  0x68   : > { %p3392_p8 = pnand %p3390_p7, %p3387_p4 }
  0x6a   : > { %3395 = shalt.err (!%p3392_p8)
}
  0x6b   : > { %s3396_s8 = scalar_lea.vmem %s462_s29, 1024  ;;  %p3404_p6 = scmp.lt.s32.totalorder %s462_s29, %s462_s29 }
  0x6c   : > { %p3397_p11 = scmp.ne.s32.totalorder %s462_s29, %s3396_s8  ;;  %p3405_p9 = scmp.lt.s32.totalorder %s3396_s8, %s3396_s8 }
  0x6e   : > { %p3399_p13 = pnand %p3397_p11, %p3760_p0  ;;  %p3406_p5 = por %p3405_p9, %p3404_p6 }
  0x70   : > { %p3400_p1 = pneg %p3399_p13 }
  0x72   : > { %p3407_p10 = pnand %p3406_p5, %p3400_p1 }
  0x74   : > { %3410 = shalt.err (!%p3407_p10)
}
  0x75   : > { %3224 = dma.hbm_to_vmem [thread:$0]  (!%p3744_p12), %s4406_s23, 1024, %s462_s29, [#allocation3], %s3578_s1, %s3578_s1, %s3579_s27  }
  0x76   : > { %s3580_s28 = smov [#allocation7]   ;;  %s3581_s25 = smov [#allocation10]  }
  0x77   : > { %s493_s2 = sshll.u32 %s3580_s28, 4  ;;  %s525_s20 = sshll.u32 %s3581_s25, 4  ;;  %s494_s2 = int_to_ptr.vmem [resolvable:$true] %s493_s2  ;;  %s526_s20 = int_to_ptr.vmem [resolvable:$true] %s525_s20 }
  0x78   : > { %s3411_s26 = scalar_lea.hbm %s4354_s5, 1024 }
  0x79   : > { %p3412_p5 = scmp.ne.s32.totalorder %s4354_s5, %s3411_s26  ;;  %p3418_p3 = scmp.lt.u32.totalorder %s3411_s26, %s4354_s5 }
  0x7b   : > { %p3414_p10 = pnand %p3412_p5, %p3760_p0 }
  0x7d   : > { %p3415_p2 = pneg %p3414_p10 }
  0x7f   : > { %p3420_p4 = pnand %p3418_p3, %p3415_p2 }
  0x81   : > { %3423 = shalt.err (!%p3420_p4)
}
  0x82   : > { %s3424_s29 = scalar_lea.vmem %s494_s2, 1024  ;;  %p3432_p13 = scmp.lt.s32.totalorder %s494_s2, %s494_s2 }
  0x83   : > { %p3425_p7 = scmp.ne.s32.totalorder %s494_s2, %s3424_s29  ;;  %p3433_p1 = scmp.lt.s32.totalorder %s3424_s29, %s3424_s29 }
  0x85   : > { %p3427_p8 = pnand %p3425_p7, %p3760_p0  ;;  %p3434_p6 = por %p3433_p1, %p3432_p13 }
  0x87   : > { %p3428_p11 = pneg %p3427_p8 }
  0x89   : > { %p3435_p9 = pnand %p3434_p6, %p3428_p11 }
  0x8b   : > { %3438 = shalt.err (!%p3435_p9)
}
  0x8c   : > { %3230 = dma.hbm_to_vmem [thread:$0]  (!%p3744_p12), %s4354_s5, 1024, %s494_s2, [#allocation6], %s3578_s1, %s3578_s1, %s3579_s27  }
  0x8d   : > { %s3439_s25 = scalar_lea.hbm %s4358_s9, 1024 }
  0x8e   : > { %p3440_p5 = scmp.ne.s32.totalorder %s4358_s9, %s3439_s25  ;;  %p3446_p3 = scmp.lt.u32.totalorder %s3439_s25, %s4358_s9 }
  0x90   : > { %p3442_p10 = pnand %p3440_p5, %p3760_p0 }
  0x92   : > { %p3443_p2 = pneg %p3442_p10 }
  0x94   : > { %p3448_p4 = pnand %p3446_p3, %p3443_p2 }
  0x96   : > { %3451 = shalt.err (!%p3448_p4)
}
  0x97   : > { %s3452_s21 = scalar_lea.vmem %s526_s20, 1024  ;;  %p3460_p13 = scmp.lt.s32.totalorder %s526_s20, %s526_s20 }
  0x98   : > { %p3453_p7 = scmp.ne.s32.totalorder %s526_s20, %s3452_s21  ;;  %p3461_p1 = scmp.lt.s32.totalorder %s3452_s21, %s3452_s21 }
  0x9a   : > { %p3455_p8 = pnand %p3453_p7, %p3760_p0  ;;  %p3462_p6 = por %p3461_p1, %p3460_p13 }
  0x9c   : > { %p3456_p11 = pneg %p3455_p8 }
  0x9e   : > { %p3463_p9 = pnand %p3462_p6, %p3456_p11 }
  0xa0   : > { %3466 = shalt.err (!%p3463_p9)
}
  0xa1   : > { %3236 = dma.hbm_to_vmem [thread:$0]  (!%p3744_p12), %s4358_s9, 1024, %s526_s20, [#allocation9], %s3578_s1, %s3578_s1, %s3579_s27  }
  0xa2   : > { %s3582_s3 = smov [#allocation11]   ;;  %s3467_s25 = scalar_lea.hbm %s4359_s10, 1024 }
  0xa3   : > { %s538_s7 = sshll.u32 %s3582_s3, 4  ;;  %p3468_p5 = scmp.ne.s32.totalorder %s4359_s10, %s3467_s25  ;;  %s539_s7 = int_to_ptr.vmem [resolvable:$true] %s538_s7 }
  0xa4   : > { %p3474_p3 = scmp.lt.u32.totalorder %s3467_s25, %s4359_s10 }
  0xa5   : > { %p3470_p10 = pnand %p3468_p5, %p3760_p0 }
  0xa7   : > { %p3471_p2 = pneg %p3470_p10 }
  0xa9   : > { %p3476_p4 = pnand %p3474_p3, %p3471_p2 }
  0xab   : > { %3479 = shalt.err (!%p3476_p4)
}
  0xac   : > { %s3480_s20 = scalar_lea.vmem %s539_s7, 1024  ;;  %p3488_p13 = scmp.lt.s32.totalorder %s539_s7, %s539_s7 }
  0xad   : > { %p3481_p7 = scmp.ne.s32.totalorder %s539_s7, %s3480_s20  ;;  %p3489_p1 = scmp.lt.s32.totalorder %s3480_s20, %s3480_s20 }
  0xaf   : > { %p3483_p8 = pnand %p3481_p7, %p3760_p0  ;;  %p3490_p6 = por %p3489_p1, %p3488_p13 }
  0xb1   : > { %p3484_p11 = pneg %p3483_p8 }
  0xb3   : > { %p3491_p9 = pnand %p3490_p6, %p3484_p11 }
  0xb5   : > { %3494 = shalt.err (!%p3491_p9)
}
  0xb6   : > { %3239 = dma.hbm_to_vmem [thread:$0]  (!%p3744_p12), %s4359_s10, 1024, %s539_s7, [#allocation12], %s3578_s1, %s3578_s1, %s3579_s27  }
  0xb7   : > { %p4407_p5 = scmp.ne.s32.totalorder %s4401_s24, 0 }
  0xb8   : > { %p4408_p0 = scmp.eq.s32.totalorder (!%p4407_p5), %s3706_s0, 0 }
  0xb9   : > { %583 = sbr.rel (%p4407_p5) target bundleno = 1890 (0x762), region = 92 }
  0xc0   : > { %3540 = dma.done.wait (%p4408_p0), [#allocation3], 1024   ;;  %p4409_p10 = pmov %p4408_p0 }
  0xc1   : > { %p4410_p2 = pmov %p4408_p0 }
  0xc2   : > { %3542 = vsyncadd (%p4409_p10), [#allocation3], 4294966272 }
  0xc3   : > { %3544 = dma.done.wait (%p4410_p2), [#allocation6], 2048   ;;  %p4411_p3 = pmov %p4408_p0 }
  0xc4   : > { %p4412_p4 = pmov %p4408_p0 }
  0xc5   : > { %3546 = vsyncadd (%p4411_p3), [#allocation6], 4294965248 }
  0xc6   : > { %3548 = dma.done.wait (%p4412_p4), [#allocation9], 2048   ;;  %p4413_p12 = pmov %p4408_p0 }
  0xc7   : > { %p4414_p7 = pmov %p4408_p0 }
  0xc8   : > { %3550 = vsyncadd (%p4413_p12), [#allocation9], 4294965248 }
  0xc9   : > { %3552 = dma.done.wait (%p4414_p7), [#allocation12], 1024   ;;  %p4415_p8 = pmov %p4408_p0 }
  0xca   : > { %p657_p11 = scmp.lt.s32.totalorder %s3706_s0, 1  ;;  %v3583_v0 = vmov 0   ;;  %v670_v1 = vld [vmem:[#allocation2] sm:$0xff]  ;;  %v671_v2 = vld [vmem:[#allocation2 + $0x8] sm:$0xff]  ;;  %v672_v6 = vld [vmem:[#allocation2 + $0x10] sm:$0xff]  ;;  %s4416_s27 = sld [smem:[#allocation27_spill]] }
  0xcb   : > { %3554 = vsyncadd (%p4415_p8), [#allocation12], 4294966272  ;;  %3303 = vset.pattern.permute.xlu0 %v3583_v0  ;;  %3304 = vset.pattern.permute.xlu1 %v3583_v0  ;;  %v815_v3 = vld [vmem:[#allocation5] sm:$0xff]  ;;  %v3051_v4 = vpack.c.bf16 %v671_v2, %v670_v1  ;;  %v816_v5 = vld [vmem:[#allocation5 + $0x8] sm:$0xff]  ;;  %vm685_vm0 = vcmask 523264   ;;  %v3584_v55 = vmov 0.0|0.0  }
  0xcc   : > { %s658_s18 = scalar_select %p657_p11, %s3706_s0, 1  ;;  %v673_v7 = vld [vmem:[#allocation2 + $0x18] sm:$0xff]  ;;  %v3067_v8 = vpack.c.bf16 %v816_v5, %v815_v3  ;;  %v817_v10 = vld [vmem:[#allocation5 + $0x10] sm:$0xff]  ;;  %v674_v12 = vld [vmem:[#allocation2 + $0x20] sm:$0xff]  ;;  %vm3585_vm1 = vmmov 0   ;;  %v3586_v56 = vmov 0.0  }
  0xcd   : > { %v3055_v9 = vpack.c.bf16 %v673_v7, %v672_v6  ;;  %v818_v11 = vld [vmem:[#allocation5 + $0x18] sm:$0xff]  ;;  %3052 = vmatprep.subr.bf16.mxu0 %v3051_v4  ;;  %v675_v14 = vld [vmem:[#allocation2 + $0x28] sm:$0xff]  ;;  %v819_v15 = vld [vmem:[#allocation5 + $0x20] sm:$0xff]  ;;  %s4417_s25 = sld [smem:[#allocation29_spill]]  ;;  %vm1841_vm12 = vcmask 64512   ;;  %s4418_s1 = sld [smem:[#allocation33_spill]] }
  0xce   : > { %s2551_s24 = sshll.u32 %s658_s18, 6  ;;  %v3071_v13 = vpack.c.bf16 %v818_v11, %v817_v10  ;;  %v820_v16 = vld [vmem:[#allocation5 + $0x28] sm:$0xff]  ;;  %3068 = vmatprep.subr.bf16.mxu1 %v3067_v8  ;;  %3054 = vmatpush3.bf16.msra.mxu0 %v3051_v4  ;;  %v3059_v17 = vpack.c.bf16 %v675_v14, %v674_v12  ;;  %v676_v20 = vld [vmem:[#allocation2 + $0x30] sm:$0xff]  ;;  %v677_v21 = vld [vmem:[#allocation2 + $0x38] sm:$0xff]  ;;  %vm2010_vm13 = vcmask 326656   ;;  %s4420_s28 = sld [smem:[#allocation32_spill]] }
  0xcf   : > { %3070 = vmatpush3.bf16.msra.mxu1 %v3067_v8  ;;  %3056 = vmatprep.subr.bf16.mxu0 %v3055_v9  ;;  %v3075_v19 = vpack.c.bf16 %v820_v16, %v819_v15  ;;  %v821_v22 = vld [vmem:[#allocation5 + $0x30] sm:$0xff]  ;;  %v822_v23 = vld [vmem:[#allocation5 + $0x38] sm:$0xff]  ;;  %v3063_v24 = vpack.c.bf16 %v677_v21, %v676_v20  ;;  %v935_v26 = vld [vmem:[#allocation7] sm:$0xff]  ;;  %s4421_s22 = sld [smem:[#allocation25_spill]]  ;;  %s2552_s30 = sshll.u32 %s3706_s0, 10 }
  0xd0   : > { %s3918_s29 = scalar_lea.vmem %s4416_s27, %s2551_s24  ;;  %3072 = vmatprep.subr.bf16.mxu1 %v3071_v13  ;;  %v3079_v25 = vpack.c.bf16 %v822_v23, %v821_v22  ;;  %v936_v27 = vld [vmem:[#allocation7 + $0x8] sm:$0xff]  ;;  %v1057_v28 = vld [vmem:[%s4364_s15] sm:$0xff]  ;;  %v937_v33 = vld [vmem:[#allocation7 + $0x10] sm:$0xff]  ;;  %s4419_s27 = sld [smem:[#allocation20_spill]] }
  0xd1   : > { %v3921_v18 = vld [vmem:[%s3918_s29] sm:$0xff]  ;;  %1063 = vperm.xlu0 %3303, %v1057_v28   ;;  %v1058_v29 = vld [vmem:[%s4364_s15 + $0x8] sm:$0xff]  ;;  %v3083_v31 = vpack.c.bf16 %v936_v27, %v935_v26  ;;  %v938_v34 = vld [vmem:[#allocation7 + $0x18] sm:$0xff]  ;;  %s4422_s21 = sld [smem:[#allocation34_spill]]  ;;  %s3587_s24 = smov [#allocation13]  }
  0xd2   : > { %2730 = vmatprep.mubr.msk.f32.mxu0 %vm685_vm0, %v3921_v18  ;;  %2758 = vmatprep.mubr.msk.f32.mxu1 %vm685_vm0, %v3921_v18  ;;  %v1092_v30 = vld [vmem:[%s4366_s17] sm:$0xff]  ;;  %v1093_v32 = vld [vmem:[%s4366_s17 + $0x8] sm:$0xff]  ;;  %v1059_v36 = vld [vmem:[%s4364_s15 + $0x10] sm:$0xff]  ;;  %v3087_v38 = vpack.c.bf16 %v938_v34, %v937_v33  ;;  %s3499_s19 = sshll.u32 %s3587_s24, 4  ;;  %s3500_s19 = int_to_ptr.vmem [resolvable:$false] %s3499_s19 }
  0xd3   : > { %3058 = vmatpush3.bf16.msra.mxu0 %v3055_v9  ;;  %3074 = vmatpush3.bf16.msra.mxu1 %v3071_v13  ;;  %v663_v35 = vld [vmem:[%s3918_s29 + $0x8] sm:$0xff]  ;;  %v664_v37 = vld [vmem:[%s3918_s29 + $0x10] sm:$0xff]  ;;  %v939_v39 = vld [vmem:[#allocation7 + $0x20] sm:$0xff] }
  0xd4   : > { %3060 = vmatprep.subr.bf16.mxu0 %v3059_v17  ;;  %3076 = vmatprep.subr.bf16.mxu1 %v3075_v19  ;;  %v940_v40 = vld [vmem:[#allocation7 + $0x28] sm:$0xff]  ;;  %v1094_v41 = vld [vmem:[%s4366_s17 + $0x10] sm:$0xff]  ;;  %v665_v42 = vld [vmem:[%s3918_s29 + $0x18] sm:$0xff] }
  0xd5   : > { %1066 = vperm.xlu1 %3304, %v1058_v29   ;;  %1098 = vperm.xlu0 %3303, %v1092_v30   ;;  %v1060_v43 = vld [vmem:[%s4364_s15 + $0x18] sm:$0xff]  ;;  %v666_v44 = vld [vmem:[%s3918_s29 + $0x20] sm:$0xff]  ;;  %v3091_v45 = vpack.c.bf16 %v940_v40, %v939_v39  ;;  %v941_v46 = vld [vmem:[#allocation7 + $0x30] sm:$0xff]  ;;  %p4423_p1 = scmp.ne.s32.totalorder %s4421_s22, 0 }
  0xd6   : > { %v942_v47 = vld [vmem:[#allocation7 + $0x38] sm:$0xff]  ;;  %v667_v49 = vld [vmem:[%s3918_s29 + $0x28] sm:$0xff]  ;;  %v1061_v50 = vld [vmem:[%s4364_s15 + $0x20] sm:$0xff]  ;;  %s654_s3 = sand.u32 1, %s4419_s27  }
  0xd7   : > { %3062 = vmatpush3.bf16.msra.mxu0 %v3059_v17  ;;  %3078 = vmatpush3.bf16.msra.mxu1 %v3075_v19  ;;  %v1095_v48 = vld [vmem:[%s4366_s17 + $0x18] sm:$0xff]  ;;  %v668_v51 = vld [vmem:[%s3918_s29 + $0x30] sm:$0xff]  ;;  %v3095_v52 = vpack.c.bf16 %v942_v47, %v941_v46  ;;  %v1096_v53 = vld [vmem:[%s4366_s17 + $0x20] sm:$0xff]  ;;  %v1055_v17 = vlaneseq  ;;  %s2444_s7 = sshll.u32 %s654_s3, 6  ;;  %s4300_s2 = scalar_lea.hbm %s4422_s21, %s2552_s30 }
  0xd8   : > { %3064 = vmatprep.subr.bf16.mxu0 %v3063_v24  ;;  %3080 = vmatprep.subr.bf16.mxu1 %v3079_v25  ;;  %v669_v54 = vld [vmem:[%s3918_s29 + $0x38] sm:$0xff]  ;;  %v2447_v57 = vld [vmem:[%s4417_s25] ss:$0 sm:$0xff]  ;;  %s656_s25 = scalar_lea.vmem [#allocation13], %s2444_s7  ;;  %s4308_s0 = scalar_lea.sflag [#allocation4], %s654_s3 }
  0xd9   : > { %1101 = vperm.xlu1 %3304, %v1093_v32   ;;  %1069 = vperm.xlu0 %3303, %v1059_v36   ;;  %v2456_v58 = vld [vmem:[%s4353_s4] ss:$0 sm:$0xff]  ;;  %v4008_v30 = vand.u32 127, %v1055_v17  ;;  %s2306_s26 = sshll.u32 %s656_s25, 4  ;;  %s4302_s26 = int_to_ptr.vmem [resolvable:$true] %s2306_s26 }
  0xda   : > { %v4014_v39 = vld [vmem:[%s4355_s6] ss:$0 sm:$0xff]  ;;  %s3495_s18 = scalar_lea.vmem %s4302_s26, 1024  ;;  %p3502_p5 = scmp.lt.s32.totalorder %s4302_s26, %s3500_s19 }
  0xdb   : > { %3066 = vmatpush3.bf16.msra.mxu0 %v3063_v24  ;;  %3082 = vmatpush3.bf16.msra.mxu1 %v3079_v25  ;;  %p3496_p13 = scmp.ne.s32.totalorder %s4302_s26, %s3495_s18 }
  0xdc   : > { %3084 = vmatprep.subr.bf16.mxu0 %v3083_v31  ;;  %3099 = vmatprep.subr.bf16.mxu1 %v3584_v55 }
  0xdd   : > { %1104 = vperm.xlu1 %3304, %v1094_v41   ;;  %1072 = vperm.xlu0 %3303, %v1060_v43   ;;  %v1473_v43 = vld [vmem:[#allocation11] sm:$0xff]  ;;  %p3497_p6 = pnand %p3496_p13, %p4423_p1 }
  0xde   : > { %2731 = vmatmul.mubr.msk.f32.vlgmr.msra.gmra.mrb[0].mxu0 %vm685_vm0, %v663_v35  ;;  %2759 = vmatmul.mubr.msk.f32.vlgmr.msra.gmra.mrb[0].mxu1 %vm685_vm0, %v663_v35 }
  0xdf   : > { %2733 = vmatprep.mubr.msk.f32.mxu0 %vm685_vm0, %v664_v37  ;;  %2761 = vmatprep.mubr.msk.f32.mxu1 %vm685_vm0, %v664_v37  ;;  %p3498_p9 = pneg %p3497_p6 }
  0xe0   : > { %3086 = vmatpush3.bf16.msra.mxu0 %v3083_v31 }
  0xe1   : > { %3088 = vmatprep.subr.bf16.mxu0 %v3087_v38  ;;  %1107 = vperm.xlu1 %3304, %v1095_v48  }
  0xe2   : > { %2734 = vmatmul.mubr.msk.f32.gmra.mrb[2].mxu0 %vm685_vm0, %v665_v42  ;;  %2762 = vmatmul.mubr.msk.f32.gmra.mrb[2].mxu1 %vm685_vm0, %v665_v42 }
  0xe3   : > { %2736 = vmatprep.mubr.msk.f32.mxu0 %vm685_vm0, %v666_v44  ;;  %2764 = vmatprep.mubr.msk.f32.mxu1 %vm685_vm0, %v666_v44 }
  0xe4   : > { %3090 = vmatpush3.bf16.msra.mxu0 %v3087_v38  ;;  %1075 = vperm.xlu0 %3303, %v1061_v50  }
  0xe5   : > { %3092 = vmatprep.subr.bf16.mxu0 %v3091_v45  ;;  %1110 = vperm.xlu1 %3304, %v1096_v53  }
  0xe6   : > { %2737 = vmatmul.mubr.msk.f32.gmra.mrb[4].mxu0 %vm685_vm0, %v667_v49  ;;  %2765 = vmatmul.mubr.msk.f32.gmra.mrb[4].mxu1 %vm685_vm0, %v667_v49 }
  0xe7   : > { %2739 = vmatprep.mubr.msk.f32.mxu0 %vm685_vm0, %v668_v51  ;;  %2767 = vmatprep.mubr.msk.f32.mxu1 %vm685_vm0, %v668_v51 }
  0xe8   : > { %3094 = vmatpush3.bf16.msra.mxu0 %v3091_v45 }
  0xe9   : > { %3096 = vmatprep.subr.bf16.mxu0 %v3095_v52 }
  0xea   : > { %2740 = vmatmul.mubr.msk.f32.gmra.mrb[6].mxu0 %vm685_vm0, %v669_v54  ;;  %2768 = vmatmul.mubr.msk.f32.gmra.mrb[6].mxu1 %vm685_vm0, %v669_v54 }
  0xeb   : > { %2786 = vmatprep.mubr.msk.f32.mxu0 %vm685_vm0, %v3921_v18  ;;  %2814 = vmatprep.mubr.msk.f32.mxu1 %vm3585_vm1, %v3586_v56 }
  0xec   : > { %3098 = vmatpush3.bf16.msra.mxu0 %v3095_v52 }
  0xed   : > { %3111 = vmatprep.subr.bf16.mxu0 %v3584_v55 }
  0xef   : > { %2787 = vmatmul.mubr.msk.f32.vlgmr.msra.gmra.mrb[8].mxu0 %vm685_vm0, %v663_v35 }
  0xf0   : > { %2789 = vmatprep.mubr.msk.f32.mxu0 %vm685_vm0, %v664_v37 }
  0xf3   : > { %2790 = vmatmul.mubr.msk.f32.gmra.mrb[10].mxu0 %vm685_vm0, %v665_v42 }
  0xf4   : > { %2792 = vmatprep.mubr.msk.f32.mxu0 %vm685_vm0, %v666_v44  ;;  %v1474_v44 = vld [vmem:[#allocation11 + $0x8] sm:$0xff] }
  0xf7   : > { %2793 = vmatmul.mubr.msk.f32.gmra.mrb[12].mxu0 %vm685_vm0, %v667_v49 }
  0xf8   : > { %2795 = vmatprep.mubr.msk.f32.mxu0 %vm685_vm0, %v668_v51  ;;  %v3136_v51 = vpack.c.bf16 %v1474_v44, %v1473_v43 }
  0xfb   : > { %2796 = vmatmul.mubr.msk.f32.gmra.mrb[14].mxu0 %vm685_vm0, %v669_v54 }
  0xfc   : > { %2845 = vmatprep.mubr.msk.f32.mxu0 %vm3585_vm1, %v3586_v56 }
 0x150   : > { %v3999_v3 = vpop.permute.xlu0 %1063 }
 0x151   : > { %vm1077_vm2 = vcmp.eq.s32.totalorder %v4008_v30, %v3999_v3 }
 0x152   : > { %v2474_v50 = vsel %vm1077_vm2, 1.0, %v3586_v56 }
 0x154   : > { %v4001_v10 = vpop.permute.xlu1 %1066  ;;  %v1099_v25 = vpop.permute.xlu0 %1098 }
 0x155   : > { %vm1112_vm3 = vcmp.eq.s32.totalorder %v4008_v30, %v1099_v25  ;;  %vm1078_vm4 = vcmp.eq.s32.totalorder %v4008_v30, %v4001_v10 }
 0x156   : > { %v4028_v52 = vsel %vm1112_vm3, 1.0, %v3586_v56 }
 0x158   : > { %v1102_v27 = vpop.permute.xlu1 %1101  ;;  %v1070_v45 = vpop.permute.xlu0 %1069 }
 0x159   : > { %vm1113_vm5 = vcmp.eq.s32.totalorder %v4008_v30, %v1102_v27  ;;  %vm1079_vm6 = vcmp.eq.s32.totalorder %v4008_v30, %v1070_v45  ;;  %v1465_v27 = vld [vmem:[#allocation10] sm:$0xff] }
 0x15a   : > { %v2476_v10 = vsel %vm1079_vm6, 1.0, %v3586_v56 }
 0x15c   : > { %v1105_v48 = vpop.permute.xlu1 %1104 }
 0x15d   : > { %vm1114_vm7 = vcmp.eq.s32.totalorder %v4008_v30, %v1105_v48 }
 0x1b1   : > { %v2732_v59 = vpop.f32.mrb[0].mxu0  ;;  %v2760_v61 = vpop.f32.mrb[0].mxu1 }
 0x1b2   : > { %v782_v60 = vadd.f32 %v2732_v59, %v2447_v57  ;;  %v776_v62 = vpop.f32.mrb[1].mxu0  ;;  %v902_v63 = vadd.f32 %v2760_v61, %v2456_v58  ;;  %v896_v1 = vpop.f32.mrb[1].mxu1 }
 0x1b3   : > { %v777_v0 = vadd.f32 %v2447_v57, %v776_v62  ;;  %v897_v2 = vadd.f32 %v2456_v58, %v896_v1  ;;  %v2475_v62 = vsel %vm1078_vm4, 1.0, %v3586_v56  ;;  %v4043_v1 = vsel %vm1113_vm5, 1.0, %v3586_v56 }
 0x1b5   : > { %v3100_v4 = vpack.c.bf16 %v782_v60, %v777_v0  ;;  %v2735_v5 = vpop.f32.mrb[2].mxu0  ;;  %v3112_v6 = vpack.c.bf16 %v902_v63, %v897_v2  ;;  %v2763_v8 = vpop.f32.mrb[2].mxu1 }
 0x1b6   : > { %v792_v7 = vadd.f32 %v2735_v5, %v2447_v57  ;;  %v786_v9 = vpop.f32.mrb[3].mxu0  ;;  %v912_v11 = vadd.f32 %v2763_v8, %v2456_v58  ;;  %v906_v13 = vpop.f32.mrb[3].mxu1  ;;  %v1477_v5 = vld [vmem:[#allocation11 + $0x20] sm:$0xff] }
 0x1b7   : > { %v787_v12 = vadd.f32 %v2447_v57, %v786_v9  ;;  %3101 = vmatpush3.bf16.msra.mxu1 %v3100_v4  ;;  %v907_v14 = vadd.f32 %v2456_v58, %v906_v13  ;;  %3113 = vmatpush3.bf16.msra.mxu0 %v3112_v6  ;;  %v1073_v63 = vpop.permute.xlu0 %1072  ;;  %v1108_v2 = vpop.permute.xlu1 %1107  ;;  %v1478_v6 = vld [vmem:[#allocation11 + $0x28] sm:$0xff] }
 0x1b8   : > { %3102 = vmatprep.subr.bf16.mxu1 %v3584_v55  ;;  %3114 = vmatprep.subr.bf16.mxu0 %v3584_v55  ;;  %vm1080_vm8 = vcmp.eq.s32.totalorder %v4008_v30, %v1073_v63  ;;  %vm1115_vm9 = vcmp.eq.s32.totalorder %v4008_v30, %v1108_v2 }
 0x1b9   : > { %v3103_v15 = vpack.c.bf16 %v792_v7, %v787_v12  ;;  %v2738_v16 = vpop.f32.mrb[4].mxu0  ;;  %v3115_v18 = vpack.c.bf16 %v912_v11, %v907_v14  ;;  %v2766_v20 = vpop.f32.mrb[4].mxu1  ;;  %v3142_v11 = vpack.c.bf16 %v1478_v6, %v1477_v5  ;;  %v2481_v12 = vsel %vm1114_vm7, 1.0, %v3586_v56 }
 0x1ba   : > { %v802_v19 = vadd.f32 %v2738_v16, %v2447_v57  ;;  %v796_v21 = vpop.f32.mrb[5].mxu0  ;;  %v922_v22 = vadd.f32 %v2766_v20, %v2456_v58  ;;  %v916_v24 = vpop.f32.mrb[5].mxu1  ;;  %v1480_v16 = vld [vmem:[#allocation11 + $0x38] sm:$0xff]  ;;  %v2482_v25 = vsel %vm1115_vm9, 1.0, %v3586_v56 }
 0x1bb   : > { %v797_v23 = vadd.f32 %v2447_v57, %v796_v21  ;;  %3104 = vmatpush3.bf16.msra.mxu1 %v3103_v15  ;;  %v917_v26 = vadd.f32 %v2456_v58, %v916_v24  ;;  %3116 = vmatpush3.bf16.msra.mxu0 %v3115_v18  ;;  %v1479_v15 = vld [vmem:[#allocation11 + $0x30] sm:$0xff]  ;;  %v1076_v18 = vpop.permute.xlu0 %1075  ;;  %v1111_v21 = vpop.permute.xlu1 %1110 }
 0x1bc   : > { %3105 = vmatprep.subr.bf16.mxu1 %v3584_v55  ;;  %3117 = vmatprep.subr.bf16.mxu0 %v3584_v55  ;;  %v3145_v24 = vpack.c.bf16 %v1480_v16, %v1479_v15  ;;  %vm1081_vm10 = vcmp.eq.s32.totalorder %v4008_v30, %v1076_v18  ;;  %vm1116_vm11 = vcmp.eq.s32.totalorder %v4008_v30, %v1111_v21  ;;  %v1732_v15 = vld [vmem:[%s4361_s12 + $0x20] sm:$0xff]  ;;  %v1733_v16 = vld [vmem:[%s4361_s12 + $0x28] sm:$0xff] }
 0x1bd   : > { %v3106_v28 = vpack.c.bf16 %v802_v19, %v797_v23  ;;  %v2741_v29 = vpop.f32.mrb[6].mxu0  ;;  %v3118_v31 = vpack.c.bf16 %v922_v22, %v917_v26  ;;  %v2769_v33 = vpop.f32.mrb[6].mxu1  ;;  %v2477_v23 = vsel %vm1080_vm8, 1.0, %v3586_v56  ;;  %v3166_v18 = vpack.c.bf16 %v1733_v16, %v1732_v15 }
 0x1be   : > { %v812_v32 = vadd.f32 %v2741_v29, %v2447_v57  ;;  %v806_v34 = vpop.f32.mrb[7].mxu0  ;;  %v932_v35 = vadd.f32 %v2769_v33, %v2456_v58  ;;  %v926_v37 = vpop.f32.mrb[7].mxu1  ;;  %v2478_v29 = vsel %vm1081_vm10, 1.0, %v3586_v56  ;;  %v1468_v33 = vld [vmem:[#allocation10 + $0x18] sm:$0xff] }
 0x1bf   : > { %v807_v36 = vadd.f32 %v2447_v57, %v806_v34  ;;  %3107 = vmatpush3.bf16.msra.mxu1 %v3106_v28  ;;  %v927_v38 = vadd.f32 %v2456_v58, %v926_v37  ;;  %3119 = vmatpush3.bf16.msra.mxu0 %v3118_v31  ;;  %v1475_v57 = vld [vmem:[#allocation11 + $0x10] sm:$0xff]  ;;  %v1476_v58 = vld [vmem:[#allocation11 + $0x18] sm:$0xff]  ;;  %v1466_v28 = vld [vmem:[#allocation10 + $0x8] sm:$0xff]  ;;  %v2483_v31 = vsel %vm1116_vm11, 1.0, %v3586_v56 }
 0x1c0   : > { %3108 = vmatprep.subr.bf16.mxu1 %v3584_v55  ;;  %3120 = vmatprep.subr.bf16.mxu0 %v3584_v55  ;;  %v3139_v0 = vpack.c.bf16 %v1476_v58, %v1475_v57  ;;  %v3148_v30 = vpack.c.bf16 %v1466_v28, %v1465_v27 }
 0x1c1   : > { %v3109_v40 = vpack.c.bf16 %v812_v32, %v807_v36  ;;  %v3121_v41 = vpack.c.bf16 %v932_v35, %v927_v38  ;;  %v1467_v32 = vld [vmem:[#allocation10 + $0x10] sm:$0xff]  ;;  %v1469_v35 = vld [vmem:[#allocation10 + $0x20] sm:$0xff]  ;;  %v1470_v36 = vld [vmem:[#allocation10 + $0x28] sm:$0xff] }
 0x1c2   : > { %v2788_v42 = vpop.f32.mrb[8].mxu0  ;;  %v3151_v34 = vpack.c.bf16 %v1468_v33, %v1467_v32  ;;  %v3154_v37 = vpack.c.bf16 %v1470_v36, %v1469_v35  ;;  %v1471_v38 = vld [vmem:[#allocation10 + $0x30] sm:$0xff] }
 0x1c3   : > { %3110 = vmatpush3.bf16.msra.mxu1 %v3109_v40  ;;  %v1022_v46 = vadd.f32 %v2788_v42, %v4014_v39  ;;  %v1016_v47 = vpop.f32.mrb[9].mxu0  ;;  %3122 = vmatpush3.bf16.msra.mxu0 %v3121_v41 }
 0x1c4   : > { %v1017_v49 = vadd.f32 %v4014_v39, %v1016_v47  ;;  %3123 = vmatprep.subr.bf16.mxu1 %v3584_v55  ;;  %3135 = vmatprep.subr.bf16.mxu0 %v3584_v55 }
 0x1c6   : > { %v3124_v53 = vpack.c.bf16 %v1022_v46, %v1017_v49  ;;  %2815 = vmatmul.mubr.msk.f32.vlgmr.msra.gmra.mrb[8].mxu1 %vm685_vm0, %v2474_v50  ;;  %v2791_v54 = vpop.f32.mrb[10].mxu0  ;;  %2846 = vmatmul.mubr.msk.f32.vlgmr.msra.gmra.mrb[16].mxu0 %vm685_vm0, %v4028_v52 }
 0x1c7   : > { %v1032_v59 = vadd.f32 %v2791_v54, %v4014_v39  ;;  %2817 = vmatprep.mubr.msk.f32.mxu1 %vm3585_vm1, %v3586_v56  ;;  %v1026_v60 = vpop.f32.mrb[11].mxu0  ;;  %2848 = vmatprep.mubr.msk.f32.mxu0 %vm3585_vm1, %v3586_v56 }
 0x1c8   : > { %v1027_v61 = vadd.f32 %v4014_v39, %v1026_v60  ;;  %3125 = vmatpush3.bf16.msra.mxu1 %v3124_v53  ;;  %3137 = vmatpush3.bf16.msra.mxu0 %v3136_v51 }
 0x1c9   : > { %3126 = vmatprep.subr.bf16.mxu1 %v3584_v55  ;;  %3138 = vmatprep.subr.bf16.mxu0 %v3584_v55 }
 0x1ca   : > { %v3127_v3 = vpack.c.bf16 %v1032_v59, %v1027_v61  ;;  %2818 = vmatmul.mubr.msk.f32.gmra.mrb[10].mxu1 %vm685_vm0, %v2475_v62  ;;  %v2794_v4 = vpop.f32.mrb[12].mxu0  ;;  %2849 = vmatmul.mubr.msk.f32.gmra.mrb[18].mxu0 %vm685_vm0, %v4043_v1 }
 0x1cb   : > { %v1042_v7 = vadd.f32 %v2794_v4, %v4014_v39  ;;  %2820 = vmatprep.mubr.msk.f32.mxu1 %vm3585_vm1, %v3586_v56  ;;  %v1036_v8 = vpop.f32.mrb[13].mxu0  ;;  %2851 = vmatprep.mubr.msk.f32.mxu0 %vm3585_vm1, %v3586_v56 }
 0x1cc   : > { %v1037_v9 = vadd.f32 %v4014_v39, %v1036_v8  ;;  %3128 = vmatpush3.bf16.msra.mxu1 %v3127_v3  ;;  %3140 = vmatpush3.bf16.msra.mxu0 %v3139_v0 }
 0x1cd   : > { %3129 = vmatprep.subr.bf16.mxu1 %v3584_v55  ;;  %3141 = vmatprep.subr.bf16.mxu0 %v3584_v55 }
 0x1ce   : > { %v3130_v13 = vpack.c.bf16 %v1042_v7, %v1037_v9  ;;  %2821 = vmatmul.mubr.msk.f32.gmra.mrb[12].mxu1 %vm685_vm0, %v2476_v10  ;;  %v2797_v14 = vpop.f32.mrb[14].mxu0  ;;  %2852 = vmatmul.mubr.msk.f32.gmra.mrb[20].mxu0 %vm685_vm0, %v2481_v12  ;;  %v1728_v9 = vld [vmem:[%s4361_s12] sm:$0xff]  ;;  %v1729_v10 = vld [vmem:[%s4361_s12 + $0x8] sm:$0xff] }
 0x1cf   : > { %v1052_v19 = vadd.f32 %v2797_v14, %v4014_v39  ;;  %2823 = vmatprep.mubr.msk.f32.mxu1 %vm3585_vm1, %v3586_v56  ;;  %v1046_v20 = vpop.f32.mrb[15].mxu0  ;;  %2854 = vmatprep.mubr.msk.f32.mxu0 %vm3585_vm1, %v3586_v56 }
 0x1d0   : > { %v1047_v22 = vadd.f32 %v4014_v39, %v1046_v20  ;;  %3131 = vmatpush3.bf16.msra.mxu1 %v3130_v13  ;;  %3143 = vmatpush3.bf16.msra.mxu0 %v3142_v11  ;;  %v1472_v39 = vld [vmem:[#allocation10 + $0x38] sm:$0xff]  ;;  %v3160_v11 = vpack.c.bf16 %v1729_v10, %v1728_v9 }
 0x1d1   : > { %3132 = vmatprep.subr.bf16.mxu1 %v3584_v55  ;;  %3144 = vmatprep.subr.bf16.mxu0 %v3584_v55  ;;  %v3157_v40 = vpack.c.bf16 %v1472_v39, %v1471_v38  ;;  %v1731_v13 = vld [vmem:[%s4361_s12 + $0x18] sm:$0xff] }
 0x1d2   : > { %v3133_v26 = vpack.c.bf16 %v1052_v19, %v1047_v22  ;;  %2824 = vmatmul.mubr.msk.f32.gmra.mrb[14].mxu1 %vm685_vm0, %v2477_v23  ;;  %2855 = vmatmul.mubr.msk.f32.gmra.mrb[22].mxu0 %vm685_vm0, %v2482_v25  ;;  %v1734_v19 = vld [vmem:[%s4361_s12 + $0x30] sm:$0xff]  ;;  %v1735_v20 = vld [vmem:[%s4361_s12 + $0x38] sm:$0xff] }
 0x1d3   : > { %2826 = vmatprep.mubr.msk.f32.mxu1 %vm3585_vm1, %v3586_v56  ;;  %2857 = vmatprep.mubr.msk.f32.mxu0 %vm3585_vm1, %v3586_v56  ;;  %v3169_v21 = vpack.c.bf16 %v1735_v20, %v1734_v19 }
 0x1d4   : > { %3134 = vmatpush3.bf16.msra.mxu1 %v3133_v26  ;;  %3146 = vmatpush3.bf16.msra.mxu0 %v3145_v24  ;;  %v2518_v24 = vld [vmem:[%s4360_s11] ss:$0 sm:$0xff] }
 0x1d5   : > { %3147 = vmatprep.subr.bf16.mxu1 %v3584_v55  ;;  %3159 = vmatprep.subr.bf16.mxu0 %v3584_v55 }
 0x1d6   : > { %2827 = vmatmul.mubr.msk.f32.gmra.mrb[16].mxu1 %vm685_vm0, %v2478_v29  ;;  %2858 = vmatmul.mubr.msk.f32.gmra.mrb[24].mxu0 %vm685_vm0, %v2483_v31 }
 0x1d7   : > { %2876 = vmatprep.mubr.msk.f32.mxu1 %vm3585_vm1, %v3586_v56  ;;  %2907 = vmatprep.mubr.msk.f32.mxu0 %vm3585_vm1, %v3586_v56 }
 0x1da   : > { %2877 = vmatmul.mubr.msk.f32.vlgmr.msra.gmra.mrb[18].mxu1 %vm685_vm0, %v4028_v52 }
 0x1db   : > { %2879 = vmatprep.mubr.msk.f32.mxu1 %vm3585_vm1, %v3586_v56  ;;  %3149 = vmatpush3.bf16.msra.mxu1 %v3148_v30 }
 0x1dc   : > { %3150 = vmatprep.subr.bf16.mxu1 %v3584_v55 }
 0x1de   : > { %2880 = vmatmul.mubr.msk.f32.gmra.mrb[20].mxu1 %vm685_vm0, %v4043_v1 }
 0x1df   : > { %2882 = vmatprep.mubr.msk.f32.mxu1 %vm3585_vm1, %v3586_v56  ;;  %3152 = vmatpush3.bf16.msra.mxu1 %v3151_v34 }
 0x1e0   : > { %3153 = vmatprep.subr.bf16.mxu1 %v3584_v55 }
 0x1e2   : > { %2883 = vmatmul.mubr.msk.f32.gmra.mrb[22].mxu1 %vm685_vm0, %v2481_v12  ;;  %v1730_v12 = vld [vmem:[%s4361_s12 + $0x10] sm:$0xff] }
 0x1e3   : > { %2885 = vmatprep.mubr.msk.f32.mxu1 %vm3585_vm1, %v3586_v56  ;;  %3155 = vmatpush3.bf16.msra.mxu1 %v3154_v37  ;;  %v3163_v14 = vpack.c.bf16 %v1731_v13, %v1730_v12 }
 0x1e4   : > { %3156 = vmatprep.subr.bf16.mxu1 %v3584_v55 }
 0x1e6   : > { %2886 = vmatmul.mubr.msk.f32.gmra.mrb[24].mxu1 %vm685_vm0, %v2482_v25 }
 0x1e7   : > { %2888 = vmatprep.mubr.msk.f32.mxu1 %vm3585_vm1, %v3586_v56  ;;  %3158 = vmatpush3.bf16.msra.mxu1 %v3157_v40 }
 0x1e8   : > { %2984 = vmatprep.subr.mxu1 %v3586_v56 }
 0x1ea   : > { %2889 = vmatmul.mubr.msk.f32.gmra.mrb[26].mxu1 %vm685_vm0, %v2483_v31 }
 0x1eb   : > { %2938 = vmatprep.mubr.msk.f32.mxu1 %vm3585_vm1, %v3586_v56 }
 0x299   : > { %v1246_v41 = vpop.f32.mrb[8].mxu1  ;;  %v1351_v42 = vpop.f32.mrb[16].mxu0 }
 0x29a   : > { %v2816_v43 = vpop.f32.mrb[9].mxu1  ;;  %2939 = vmatmul.mubr.msk.f32.vlgmr.msra.gmra.mrb[28].mxu1 %vm685_vm0, %v1246_v41  ;;  %v2847_v44 = vpop.f32.mrb[17].mxu0  ;;  %2908 = vmatmul.mubr.msk.f32.vlgmr.msra.gmra.mrb[26].mxu0 %vm685_vm0, %v1351_v42 }
 0x29b   : > { %2941 = vmatprep.mubr.msk.f32.mxu1 %vm3585_vm1, %v3586_v56  ;;  %2910 = vmatprep.mubr.msk.f32.mxu0 %vm3585_vm1, %v3586_v56 }
 0x29c   : > { %3161 = vmatpush3.bf16.msra.mxu0 %v3160_v11 }
 0x29d   : > { %v1251_v45 = vpop.f32.mrb[10].mxu1  ;;  %v1356_v46 = vpop.f32.mrb[18].mxu0  ;;  %3162 = vmatprep.subr.bf16.mxu0 %v3584_v55 }
 0x29e   : > { %v2819_v47 = vpop.f32.mrb[11].mxu1  ;;  %2942 = vmatmul.mubr.msk.f32.gmra.mrb[30].mxu1 %vm685_vm0, %v1251_v45  ;;  %v2850_v48 = vpop.f32.mrb[19].mxu0  ;;  %2911 = vmatmul.mubr.msk.f32.gmra.mrb[28].mxu0 %vm685_vm0, %v1356_v46 }
 0x29f   : > { %2944 = vmatprep.mubr.msk.f32.mxu1 %vm3585_vm1, %v3586_v56  ;;  %2913 = vmatprep.mubr.msk.f32.mxu0 %vm3585_vm1, %v3586_v56 }
 0x2a0   : > { %3164 = vmatpush3.bf16.msra.mxu0 %v3163_v14 }
 0x2a1   : > { %v1256_v49 = vpop.f32.mrb[12].mxu1  ;;  %v1361_v50 = vpop.f32.mrb[20].mxu0  ;;  %3165 = vmatprep.subr.bf16.mxu0 %v3584_v55 }
 0x2a2   : > { %v2822_v51 = vpop.f32.mrb[13].mxu1  ;;  %2945 = vmatmul.mubr.msk.f32.gmra.mrb[32].mxu1 %vm685_vm0, %v1256_v49  ;;  %v2853_v52 = vpop.f32.mrb[21].mxu0  ;;  %2914 = vmatmul.mubr.msk.f32.gmra.mrb[30].mxu0 %vm685_vm0, %v1361_v50 }
 0x2a3   : > { %2947 = vmatprep.mubr.msk.f32.mxu1 %vm3585_vm1, %v3586_v56  ;;  %2916 = vmatprep.mubr.msk.f32.mxu0 %vm3585_vm1, %v3586_v56 }
 0x2a4   : > { %3167 = vmatpush3.bf16.msra.mxu0 %v3166_v18 }
 0x2a5   : > { %v1261_v53 = vpop.f32.mrb[14].mxu1  ;;  %v1366_v54 = vpop.f32.mrb[22].mxu0  ;;  %3168 = vmatprep.subr.bf16.mxu0 %v3584_v55 }
 0x2a6   : > { %v2825_v57 = vpop.f32.mrb[15].mxu1  ;;  %2948 = vmatmul.mubr.msk.f32.gmra.mrb[34].mxu1 %vm685_vm0, %v1261_v53  ;;  %v2856_v58 = vpop.f32.mrb[23].mxu0  ;;  %2917 = vmatmul.mubr.msk.f32.gmra.mrb[32].mxu0 %vm685_vm0, %v1366_v54 }
 0x2a7   : > { %2950 = vmatprep.mubr.msk.f32.mxu1 %vm3585_vm1, %v3586_v56  ;;  %2919 = vmatprep.mubr.msk.f32.mxu0 %vm3585_vm1, %v3586_v56 }
 0x2a8   : > { %3170 = vmatpush3.bf16.msra.mxu0 %v3169_v21  ;;  %v1899_v21 = vld [vmem:[%s4363_s14] sm:$0xff] }
 0x2a9   : > { %v1266_v59 = vpop.f32.mrb[16].mxu1  ;;  %v1371_v60 = vpop.f32.mrb[24].mxu0  ;;  %2985 = vmatpush3.msra.mxu1 %v1899_v21  ;;  %v1888_v21 = vld [vmem:[%s4362_s13] sm:$0x1] }
 0x2aa   : > { %v2828_v61 = vpop.f32.mrb[17].mxu1  ;;  %2951 = vmatmul.mubr.msk.f32.gmra.mrb[36].mxu1 %vm685_vm0, %v1266_v59  ;;  %v2859_v62 = vpop.f32.mrb[25].mxu0  ;;  %2920 = vmatmul.mubr.msk.f32.gmra.mrb[34].mxu0 %vm685_vm0, %v1371_v60 }
 0x2ab   : > { %2986 = vmatprep.mubr.msk.f32.mxu1 %vm3585_vm1, %v3586_v56  ;;  %2969 = vmatprep.mubr.msk.f32.mxu0 %vm3585_vm1, %v3586_v56 }
 0x2ad   : > { %v4148_v63 = vpop.f32.mrb[18].mxu1 }
 0x2ae   : > { %v2878_v0 = vpop.f32.mrb[19].mxu1 }
 0x2b1   : > { %v4150_v1 = vpop.f32.mrb[20].mxu1 }
 0x2b2   : > { %v2881_v2 = vpop.f32.mrb[21].mxu1 }
 0x2b5   : > { %v4152_v3 = vpop.f32.mrb[22].mxu1 }
 0x2b6   : > { %v2884_v4 = vpop.f32.mrb[23].mxu1 }
 0x2b9   : > { %v4154_v5 = vpop.f32.mrb[24].mxu1 }
 0x2ba   : > { %v2887_v6 = vpop.f32.mrb[25].mxu1 }
 0x2bd   : > { %v4156_v7 = vpop.f32.mrb[26].mxu1 }
 0x2be   : > { %v2890_v8 = vpop.f32.mrb[27].mxu1 }
 0x36d   : > { %v1667_v22 = vpop.f32.mrb[28].mxu1  ;;  %v1562_v23 = vpop.f32.mrb[26].mxu0 }
 0x36e   : > { %v2940_v25 = vpop.f32.mrb[29].mxu1  ;;  %v1668_v26 = vadd.f32 %v1667_v22, %v1562_v23  ;;  %v2909_v27 = vpop.f32.mrb[27].mxu0 }
 0x370   : > { %v1698_v55 = vadd.f32 %v2518_v24, %v1668_v26 }
 0x371   : > { %v1672_v28 = vpop.f32.mrb[30].mxu1  ;;  %v1567_v29 = vpop.f32.mrb[28].mxu0 }
 0x372   : > { %v2943_v31 = vpop.f32.mrb[31].mxu1  ;;  %v1708_v30 = vmul.f32 0.70710677, %v1698_v55  ;;  %v1673_v32 = vadd.f32 %v1672_v28, %v1567_v29  ;;  %v2912_v33 = vpop.f32.mrb[29].mxu0  ;;  %v1703_v58 = vmul.f32 0.5, %v1698_v55 }
 0x374   : > { %3305 = verf.f32 %v1708_v30  ;;  %v1699_v34 = vadd.f32 %v2518_v24, %v1673_v32 }
 0x375   : > { %v1677_v35 = vpop.f32.mrb[32].mxu1  ;;  %v1572_v36 = vpop.f32.mrb[30].mxu0 }
 0x376   : > { %v2946_v37 = vpop.f32.mrb[33].mxu1  ;;  %v1709_v38 = vmul.f32 0.70710677, %v1699_v34  ;;  %v1678_v39 = vadd.f32 %v1677_v35, %v1572_v36  ;;  %v2915_v40 = vpop.f32.mrb[31].mxu0  ;;  %v1704_v2 = vmul.f32 0.5, %v1699_v34 }
 0x378   : > { %3307 = verf.f32 %v1709_v38  ;;  %v1700_v41 = vadd.f32 %v2518_v24, %v1678_v39 }
 0x379   : > { %v1682_v42 = vpop.f32.mrb[34].mxu1  ;;  %v1577_v43 = vpop.f32.mrb[32].mxu0 }
 0x37a   : > { %v2949_v44 = vpop.f32.mrb[35].mxu1  ;;  %v1710_v45 = vmul.f32 0.70710677, %v1700_v41  ;;  %v1683_v46 = vadd.f32 %v1682_v42, %v1577_v43  ;;  %v2918_v47 = vpop.f32.mrb[33].mxu0  ;;  %v1705_v9 = vmul.f32 0.5, %v1700_v41 }
 0x37c   : > { %3309 = verf.f32 %v1710_v45  ;;  %v1701_v48 = vadd.f32 %v2518_v24, %v1683_v46 }
 0x37d   : > { %v1687_v49 = vpop.f32.mrb[36].mxu1  ;;  %v1582_v50 = vpop.f32.mrb[34].mxu0 }
 0x37e   : > { %v2952_v51 = vpop.f32.mrb[37].mxu1  ;;  %v3306_v52 = vpop.eup %3305  ;;  %v1711_v53 = vmul.f32 0.70710677, %v1701_v48  ;;  %v1688_v54 = vadd.f32 %v1687_v49, %v1582_v50  ;;  %v1706_v13 = vmul.f32 0.5, %v1701_v48 }
 0x37f   : > { %v2921_v57 = vpop.f32.mrb[35].mxu0  ;;  %v1718_v59 = vadd.f32 1.0, %v3306_v52 }
 0x380   : > { %3311 = verf.f32 %v1711_v53  ;;  %v1702_v60 = vadd.f32 %v2518_v24, %v1688_v54 }
 0x381   : > { %v1723_v61 = vmul.f32 %v1718_v59, %v1703_v58 }
 0x382   : > { %v3308_v62 = vpop.eup %3307  ;;  %v1712_v0 = vmul.f32 0.70710677, %v1702_v60  ;;  %v1707_v18 = vmul.f32 0.5, %v1702_v60 }
 0x383   : > { %v1719_v4 = vadd.f32 1.0, %v3308_v62  ;;  %2970 = vmatmul.mubr.msk.f32.vlgmr.msra.gmra.mrb[36].mxu0 %vm685_vm0, %v1723_v61 }
 0x384   : > { %3313 = verf.f32 %v1712_v0  ;;  %2972 = vmatprep.mubr.msk.f32.mxu0 %vm3585_vm1, %v3586_v56 }
 0x385   : > { %v1724_v6 = vmul.f32 %v1719_v4, %v1704_v2 }
 0x386   : > { %v3310_v8 = vpop.eup %3309 }
 0x387   : > { %v1720_v10 = vadd.f32 1.0, %v3310_v8  ;;  %2973 = vmatmul.mubr.msk.f32.gmra.mrb[38].mxu0 %vm685_vm0, %v1724_v6 }
 0x388   : > { %2975 = vmatprep.mubr.msk.f32.mxu0 %vm3585_vm1, %v3586_v56 }
 0x389   : > { %v1725_v11 = vmul.f32 %v1720_v10, %v1705_v9 }
 0x38a   : > { %v3312_v12 = vpop.eup %3311 }
 0x38b   : > { %v1721_v14 = vadd.f32 1.0, %v3312_v12  ;;  %2976 = vmatmul.mubr.msk.f32.gmra.mrb[40].mxu0 %vm685_vm0, %v1725_v11 }
 0x38c   : > { %2978 = vmatprep.mubr.msk.f32.mxu0 %vm3585_vm1, %v3586_v56 }
 0x38d   : > { %v1726_v15 = vmul.f32 %v1721_v14, %v1706_v13 }
 0x38e   : > { %v3314_v16 = vpop.eup %3313 }
 0x38f   : > { %v1722_v19 = vadd.f32 1.0, %v3314_v16  ;;  %2979 = vmatmul.mubr.msk.f32.gmra.mrb[42].mxu0 %vm685_vm0, %v1726_v15 }
 0x390   : > { %2981 = vmatprep.mubr.msk.f32.mxu0 %vm3585_vm1, %v3586_v56 }
 0x391   : > { %v1727_v20 = vmul.f32 %v1722_v19, %v1707_v18 }
 0x393   : > { %2982 = vmatmul.mubr.msk.f32.gmra.mrb[44].mxu0 %vm685_vm0, %v1727_v20  ;;  %v4215_v20 = vshrl.u32 %v1055_v17, 7  ;;  %v4237_v17 = vld [vmem:[%s4418_s1] ss:$0 sm:$0xff]  ;;  %s3501_s1 = scalar_lea.vmem %s3500_s19, 2048 }
 0x394   : > { %p3503_p0 = scmp.lt.s32.totalorder %s3501_s1, %s3495_s18 }
 0x395   : > { %vm1141_vm14 = vcmp.eq.s32.totalorder %v4215_v20, %v4237_v17 }
 0x396   : > { %p3504_p10 = por %p3503_p0, %p3502_p5 }
 0x398   : > { %p3505_p2 = pnand %p3504_p10, %p3498_p9 }
 0x456   : > { %v1817_v22 = vpop.f32.mrb[36].mxu0 }
 0x457   : > { %v2971_v23 = vpop.f32.mrb[37].mxu0  ;;  %v1842_v33 = vsel %vm1841_vm12, %v1817_v22, -inf }
 0x45a   : > { %v1822_v24 = vpop.f32.mrb[38].mxu0 }
 0x45b   : > { %v2974_v25 = vpop.f32.mrb[39].mxu0  ;;  %v1843_v37 = vsel %vm1841_vm12, %v1822_v24, -inf }
 0x45e   : > { %v1827_v26 = vpop.f32.mrb[40].mxu0 }
 0x45f   : > { %v2977_v27 = vpop.f32.mrb[41].mxu0  ;;  %v1844_v28 = vsel %vm1841_vm12, %v1827_v26, -inf }
 0x462   : > { %v1832_v55 = vpop.f32.mrb[42].mxu0 }
 0x463   : > { %v1845_v29 = vsel %vm1841_vm12, %v1832_v55, -inf  ;;  %v2980_v31 = vpop.f32.mrb[43].mxu0 }
 0x464   : > { %v1849_v30 = vmax.f32 %v1844_v28, %v1845_v29  ;;  %v2485_v31 = vsel %vm1141_vm14, 1.0, %v3586_v56 }
 0x465   : > { %3011 = vmatprep.mubr.msk.f32.mxu0 %vm2010_vm13, %v2485_v31 }
 0x466   : > { %v1837_v32 = vpop.f32.mrb[44].mxu0 }
 0x467   : > { %v1846_v34 = vsel %vm1841_vm12, %v1837_v32, -inf  ;;  %v2983_v35 = vpop.f32.mrb[45].mxu0 }
 0x468   : > { %v1847_v36 = vmax.f32 %v1842_v33, %v1846_v34  ;;  %v2142_v33 = vld [vmem:[#allocation8 + $0x10] sm:$0xff]  ;;  %v2143_v35 = vld [vmem:[#allocation8 + $0x18] sm:$0xff] }
 0x46a   : > { %v1848_v38 = vmax.f32 %v1847_v36, %v1843_v37  ;;  %v3183_v36 = vpack.c.bf16 %v2143_v35, %v2142_v33  ;;  %v2144_v37 = vld [vmem:[#allocation8 + $0x20] sm:$0xff] }
 0x46c   : > { %v1850_v39 = vmax.f32 %v1848_v38, %v1849_v30  ;;  %v2140_v30 = vld [vmem:[#allocation8] sm:$0xff]  ;;  %v2145_v38 = vld [vmem:[#allocation8 + $0x28] sm:$0xff] }
 0x46e   : > { %v1851_v40 = vrot.slane %v1850_v39, 4 }
 0x470   : > { %v1852_v41 = vmax.f32 %v1850_v39, %v1851_v40  ;;  %v3187_v39 = vpack.c.bf16 %v2145_v38, %v2144_v37  ;;  %v2146_v40 = vld [vmem:[#allocation8 + $0x30] sm:$0xff] }
 0x472   : > { %v1853_v42 = vrot.slane %v1852_v41, 2 }
 0x474   : > { %v1854_v43 = vmax.f32 %v1852_v41, %v1853_v42  ;;  %v2147_v41 = vld [vmem:[#allocation8 + $0x38] sm:$0xff] }
 0x475   : > { %v3191_v42 = vpack.c.bf16 %v2147_v41, %v2146_v40 }
 0x476   : > { %v1855_v44 = vrot.slane %v1854_v43, 1 }
 0x478   : > { %v1856_v45 = vmax.f32 %v1854_v43, %v1855_v44 }
 0x47a   : > { %v1857_v46 = vsub.f32 %v1817_v22, %v1856_v45  ;;  %v1858_v47 = vsub.f32 %v1822_v24, %v1856_v45  ;;  %v1859_v48 = vsub.f32 %v1827_v26, %v1856_v45  ;;  %v1860_v49 = vsub.f32 %v1832_v55, %v1856_v45 }
 0x47b   : > { %v1861_v50 = vsub.f32 %v1837_v32, %v1856_v45  ;;  %v1892_v22 = vsub.s32 0, %v4215_v20  ;;  %v2141_v32 = vld [vmem:[#allocation8 + $0x8] sm:$0xff] }
 0x47c   : > { %v1862_v51 = vmul.f32 1.442695, %v1857_v46  ;;  %v1864_v52 = vmul.f32 1.442695, %v1858_v47  ;;  %v1866_v53 = vmul.f32 1.442695, %v1859_v48  ;;  %v3179_v34 = vpack.c.bf16 %v2141_v32, %v2140_v30 }
 0x47d   : > { %v1868_v54 = vmul.f32 1.442695, %v1860_v49  ;;  %v1870_v57 = vmul.f32 1.442695, %v1861_v50 }
 0x47e   : > { %3315 = vpow2.f32 %v1862_v51  ;;  %3180 = vmatprep.subr.bf16.mxu1 %v3179_v34 }
 0x47f   : > { %3317 = vpow2.f32 %v1864_v52 }
 0x480   : > { %3319 = vpow2.f32 %v1866_v53 }
 0x481   : > { %3321 = vpow2.f32 %v1868_v54 }
 0x482   : > { %3323 = vpow2.f32 %v1870_v57 }
 0x488   : > { %v3316_v58 = vpop.eup %3315 }
 0x489   : > { %v3318_v59 = vpop.eup %3317  ;;  %v1872_v60 = vsel %vm1841_vm12, %v3316_v58, 0.0 }
 0x48a   : > { %v3320_v61 = vpop.eup %3319  ;;  %v1873_v62 = vsel %vm1841_vm12, %v3318_v59, 0.0 }
 0x48b   : > { %v3322_v0 = vpop.eup %3321  ;;  %v1874_v2 = vadd.f32 %v1873_v62, %v1872_v60  ;;  %v1875_v4 = vsel %vm1841_vm12, %v3320_v61, 0.0 }
 0x48c   : > { %v3324_v6 = vpop.eup %3323  ;;  %v1877_v9 = vsel %vm1841_vm12, %v3322_v0, 0.0 }
 0x48d   : > { %v1876_v8 = vadd.f32 %v1875_v4, %v1874_v2  ;;  %v1879_v11 = vsel %vm1841_vm12, %v3324_v6, 0.0  ;;  %v1134_v2 = vadd.s32 48, %v4215_v20 }
 0x48f   : > { %v1878_v10 = vadd.f32 %v1877_v9, %v1876_v8  ;;  %v1135_v8 = vadd.s32 56, %v4215_v20  ;;  %vm1147_vm5 = vcmp.eq.s32.totalorder %v1134_v2, %v4237_v17 }
 0x491   : > { %v1880_v12 = vadd.f32 %v1879_v11, %v1878_v10  ;;  %v2491_v10 = vsel %vm1147_vm5, 1.0, %v3586_v56  ;;  %vm1148_vm6 = vcmp.eq.s32.totalorder %v1135_v8, %v4237_v17 }
 0x492   : > { %v2492_v11 = vsel %vm1148_vm6, 1.0, %v3586_v56 }
 0x493   : > { %v1881_v13 = vrot.slane %v1880_v12, 4 }
 0x495   : > { %v1882_v14 = vadd.f32 %v1881_v13, %v1880_v12 }
 0x497   : > { %v1883_v15 = vrot.slane %v1882_v14, 2 }
 0x499   : > { %v1884_v16 = vadd.f32 %v1883_v15, %v1882_v14 }
 0x49b   : > { %v1885_v18 = vrot.slane %v1884_v16, 1 }
 0x49d   : > { %v1886_v19 = vadd.f32 %v1885_v18, %v1884_v16 }
 0x49f   : > { %3325 = vrcp.f32 %v1886_v19 }
 0x4a9   : > { %v3326_v23 = vpop.eup %3325 }
 0x4aa   : > { %v1889_v24 = vmul.f32 %v3326_v23, %v1888_v21 }
 0x4ac   : > { %v1893_v25 = vrot.slane %v1889_v24, %v1892_v22 }
 0x4ae   : > { %v1894_v26 = vmul.f32 %v3316_v58, %v1893_v25  ;;  %v1895_v27 = vmul.f32 %v3318_v59, %v1893_v25  ;;  %v1896_v55 = vmul.f32 %v3320_v61, %v1893_v25  ;;  %v1897_v28 = vmul.f32 %v3322_v0, %v1893_v25 }
 0x4af   : > { %v1898_v29 = vmul.f32 %v3324_v6, %v1893_v25  ;;  %v1129_v58 = vadd.s32 8, %v4215_v20 }
 0x4b0   : > { %2987 = vmatmul.mubr.msk.f32.vlgmr.msra.gmra.mrb[38].mxu1 %vm1841_vm12, %v1894_v26 }
 0x4b1   : > { %2989 = vmatprep.mubr.msk.f32.mxu1 %vm3585_vm1, %v3586_v56  ;;  %3182 = vmatpush3.bf16.msra.mxu1 %v3179_v34  ;;  %vm1142_vm15 = vcmp.eq.s32.totalorder %v1129_v58, %v4237_v17 }
 0x4b2   : > { %3184 = vmatprep.subr.bf16.mxu1 %v3183_v36  ;;  %v2486_v62 = vsel %vm1142_vm15, 1.0, %v3586_v56 }
 0x4b4   : > { %2990 = vmatmul.mubr.msk.f32.gmra.mrb[40].mxu1 %vm1841_vm12, %v1895_v27 }
 0x4b5   : > { %2992 = vmatprep.mubr.msk.f32.mxu1 %vm3585_vm1, %v3586_v56  ;;  %3186 = vmatpush3.bf16.msra.mxu1 %v3183_v36 }
 0x4b6   : > { %3188 = vmatprep.subr.bf16.mxu1 %v3187_v39 }
 0x4b8   : > { %2993 = vmatmul.mubr.msk.f32.gmra.mrb[42].mxu1 %vm1841_vm12, %v1896_v55 }
 0x4b9   : > { %2995 = vmatprep.mubr.msk.f32.mxu1 %vm3585_vm1, %v3586_v56  ;;  %3190 = vmatpush3.bf16.msra.mxu1 %v3187_v39 }
 0x4ba   : > { %3192 = vmatprep.subr.bf16.mxu1 %v3191_v42 }
 0x4bc   : > { %2996 = vmatmul.mubr.msk.f32.gmra.mrb[44].mxu1 %vm1841_vm12, %v1897_v28 }
 0x4bd   : > { %2998 = vmatprep.mubr.msk.f32.mxu1 %vm3585_vm1, %v3586_v56  ;;  %3194 = vmatpush3.bf16.msra.mxu1 %v3191_v42 }
 0x4c0   : > { %2999 = vmatmul.mubr.msk.f32.gmra.mrb[46].mxu1 %vm1841_vm12, %v1898_v29 }
 0x583   : > { %v1981_v43 = vpop.f32.mrb[38].mxu1 }
 0x584   : > { %v2005_v44 = vmul.f32 %v1981_v43, %v4148_v63  ;;  %v2988_v45 = vpop.f32.mrb[39].mxu1  ;;  %v1130_v63 = vadd.s32 16, %v4215_v20 }
 0x586   : > { %vm1143_vm1 = vcmp.eq.s32.totalorder %v1130_v63, %v4237_v17 }
 0x587   : > { %v1986_v46 = vpop.f32.mrb[40].mxu1  ;;  %v2487_v0 = vsel %vm1143_vm1, 1.0, %v3586_v56 }
 0x588   : > { %v2006_v47 = vmul.f32 %v1986_v46, %v4150_v1  ;;  %v2991_v48 = vpop.f32.mrb[41].mxu1 }
 0x58a   : > { %v3171_v49 = vpack.c.bf16 %v2006_v47, %v2005_v44 }
 0x58b   : > { %v1991_v50 = vpop.f32.mrb[42].mxu1 }
 0x58c   : > { %v2007_v51 = vmul.f32 %v1991_v50, %v4152_v3  ;;  %v2994_v52 = vpop.f32.mrb[43].mxu1  ;;  %3172 = vmatprep.subr.bf16.mxu0 %v3171_v49  ;;  %v1131_v3 = vadd.s32 24, %v4215_v20 }
 0x58d   : > { %3174 = vmatpush3.bf16.msra.mxu0 %v3171_v49 }
 0x58e   : > { %vm1144_vm2 = vcmp.eq.s32.totalorder %v1131_v3, %v4237_v17 }
 0x58f   : > { %v1996_v53 = vpop.f32.mrb[44].mxu1  ;;  %v2488_v4 = vsel %vm1144_vm2, 1.0, %v3586_v56 }
 0x590   : > { %v2008_v54 = vmul.f32 %v1996_v53, %v4154_v5  ;;  %v2997_v57 = vpop.f32.mrb[45].mxu1  ;;  %v1132_v5 = vadd.s32 32, %v4215_v20 }
 0x592   : > { %v3175_v59 = vpack.c.bf16 %v2008_v54, %v2007_v51  ;;  %vm1145_vm3 = vcmp.eq.s32.totalorder %v1132_v5, %v4237_v17 }
 0x593   : > { %v2001_v60 = vpop.f32.mrb[46].mxu1  ;;  %v2489_v6 = vsel %vm1145_vm3, 1.0, %v3586_v56 }
 0x594   : > { %v2009_v1 = vmul.f32 %v2001_v60, %v4156_v7  ;;  %v3000_v61 = vpop.f32.mrb[47].mxu1  ;;  %3176 = vmatprep.subr.bf16.mxu0 %v3175_v59  ;;  %v1133_v7 = vadd.s32 40, %v4215_v20  ;;  %v2537_v20 = vld [vmem:[%s4420_s28] ss:$0 sm:$0xff] }
 0x595   : > { %3178 = vmatpush3.bf16.msra.mxu0 %v3175_v59 }
 0x596   : > { %3009 = vmatprep.subr.mxu0 %v2009_v1  ;;  %vm1146_vm4 = vcmp.eq.s32.totalorder %v1133_v7, %v4237_v17 }
 0x597   : > { %v2490_v9 = vsel %vm1146_vm4, 1.0, %v3586_v56 }
 0x599   : > { %3010 = vmatpush3.msra.mxu0 %v2009_v1 }
 0x59a   : > { %3012 = vmatmul.mubr.msk.f32.vlgmr.msra.gmra.mrb[46].mxu0 %vm2010_vm13, %v2486_v62 }
 0x59b   : > { %3014 = vmatprep.mubr.msk.f32.mxu0 %vm2010_vm13, %v2487_v0 }
 0x59e   : > { %3015 = vmatmul.mubr.msk.f32.gmra.mrb[48].mxu0 %vm2010_vm13, %v2488_v4 }
 0x59f   : > { %3017 = vmatprep.mubr.msk.f32.mxu0 %vm2010_vm13, %v2489_v6 }
 0x5a2   : > { %3018 = vmatmul.mubr.msk.f32.gmra.mrb[50].mxu0 %vm2010_vm13, %v2490_v9 }
 0x5a3   : > { %3020 = vmatprep.mubr.msk.f32.mxu0 %vm2010_vm13, %v2491_v10 }
 0x5a6   : > { %3021 = vmatmul.mubr.msk.f32.gmra.mrb[52].mxu0 %vm2010_vm13, %v2492_v11 }
 0x66d   : > { %v3013_v12 = vpop.f32.mrb[46].mxu0 }
 0x66e   : > { %v2101_v13 = vpop.f32.mrb[47].mxu0 }
 0x66f   : > { %3039 = vmatprep.mubr.msk.f32.mxu1 %vm685_vm0, %v2101_v13 }
 0x670   : > { %3040 = vmatmul.mubr.msk.f32.vlgmr.msra.gmra.mrb[48].mxu1 %vm685_vm0, %v3013_v12 }
 0x671   : > { %v3016_v14 = vpop.f32.mrb[48].mxu0 }
 0x672   : > { %v2111_v15 = vpop.f32.mrb[49].mxu0 }
 0x673   : > { %3042 = vmatprep.mubr.msk.f32.mxu1 %vm685_vm0, %v2111_v15 }
 0x674   : > { %3043 = vmatmul.mubr.msk.f32.gmra.mrb[50].mxu1 %vm685_vm0, %v3016_v14 }
 0x675   : > { %v3019_v16 = vpop.f32.mrb[50].mxu0 }
 0x676   : > { %v2121_v18 = vpop.f32.mrb[51].mxu0 }
 0x677   : > { %3045 = vmatprep.mubr.msk.f32.mxu1 %vm685_vm0, %v2121_v18 }
 0x678   : > { %3046 = vmatmul.mubr.msk.f32.gmra.mrb[52].mxu1 %vm685_vm0, %v3019_v16 }
 0x679   : > { %v3022_v56 = vpop.f32.mrb[52].mxu0 }
 0x67a   : > { %v2131_v19 = vpop.f32.mrb[53].mxu0 }
 0x67b   : > { %3048 = vmatprep.mubr.msk.f32.mxu1 %vm685_vm0, %v2131_v19 }
 0x67c   : > { %3049 = vmatmul.mubr.msk.f32.gmra.mrb[54].mxu1 %vm685_vm0, %v3022_v56 }
 0x743   : > { %v3041_v21 = vpop.f32.mrb[48].mxu1 }
 0x744   : > { %v2251_v22 = vadd.f32 %v3041_v21, %v2537_v20  ;;  %v2245_v23 = vpop.f32.mrb[49].mxu1 }
 0x745   : > { %v2246_v24 = vadd.f32 %v2537_v20, %v2245_v23 }
 0x746   : > { %2285 = vst.msk [vmem:[%s656_s25 + $0x8] sm:$0xff] %vm685_vm0, %v2251_v22 }
 0x747   : > { %2284 = vst.msk [vmem:[%s656_s25] sm:$0xff] %vm685_vm0, %v2246_v24  ;;  %v3044_v25 = vpop.f32.mrb[50].mxu1 }
 0x748   : > { %v2261_v26 = vadd.f32 %v3044_v25, %v2537_v20  ;;  %v2255_v27 = vpop.f32.mrb[51].mxu1 }
 0x749   : > { %v2256_v55 = vadd.f32 %v2537_v20, %v2255_v27 }
 0x74a   : > { %2287 = vst.msk [vmem:[%s656_s25 + $0x18] sm:$0xff] %vm685_vm0, %v2261_v26 }
 0x74b   : > { %2286 = vst.msk [vmem:[%s656_s25 + $0x10] sm:$0xff] %vm685_vm0, %v2256_v55  ;;  %v3047_v28 = vpop.f32.mrb[52].mxu1 }
 0x74c   : > { %v2271_v29 = vadd.f32 %v3047_v28, %v2537_v20  ;;  %v2265_v17 = vpop.f32.mrb[53].mxu1 }
 0x74d   : > { %v2266_v31 = vadd.f32 %v2537_v20, %v2265_v17 }
 0x74e   : > { %2289 = vst.msk [vmem:[%s656_s25 + $0x28] sm:$0xff] %vm685_vm0, %v2271_v29 }
 0x74f   : > { %2288 = vst.msk [vmem:[%s656_s25 + $0x20] sm:$0xff] %vm685_vm0, %v2266_v31  ;;  %v3050_v30 = vpop.f32.mrb[54].mxu1 }
 0x750   : > { %v2281_v32 = vadd.f32 %v3050_v30, %v2537_v20  ;;  %v2275_v33 = vpop.f32.mrb[55].mxu1 }
 0x751   : > { %v2276_v34 = vadd.f32 %v2537_v20, %v2275_v33 }
 0x752   : > { %2291 = vst.msk [vmem:[%s656_s25 + $0x38] sm:$0xff] %vm685_vm0, %v2281_v32 }
 0x753   : > { %2290 = vst.msk [vmem:[%s656_s25 + $0x30] sm:$0xff] %vm685_vm0, %v2276_v34 }
 0x754   : > { %3508 = shalt.err (!%p3505_p2)
}
 0x755   : > { %s3509_s27 = scalar_lea.hbm %s4300_s2, 1024  ;;  %s3513_s16 = scalar_lea.hbm %s4422_s21, 2048 }
 0x756   : > { %p3510_p3 = scmp.ne.s32.totalorder %s4300_s2, %s3509_s27  ;;  %p3514_p7 = scmp.lt.u32.totalorder %s4300_s2, %s4422_s21 }
 0x757   : > { %p3515_p8 = scmp.lt.u32.totalorder %s3513_s16, %s3509_s27  ;;  %p3517_p13 = scmp.lt.u32.totalorder %s3509_s27, %s4300_s2 }
 0x758   : > { %p3511_p4 = pnand %p3510_p3, %p4423_p1 }
 0x759   : > { %p3516_p11 = por %p3515_p8, %p3514_p7 }
 0x75a   : > { %p3512_p12 = pneg %p3511_p4 }
 0x75b   : > { %p3518_p6 = por %p3517_p13, %p3516_p11 }
 0x75d   : > { %p3519_p9 = pnand %p3518_p6, %p3512_p12 }
 0x75f   : > { %3522 = shalt.err (!%p3519_p9)
}
 0x760   : > { %s3588_s25 = smov 128   ;;  %s3589_s30 = smov 8  }
 0x761   : > { %3219 = dma.vmem_to_hbm [thread:$0]  (%p4423_p1), %s4302_s26, 1024, %s4300_s2, %s4308_s0, %s3588_s25, %s3588_s25, %s3589_s30  }
 0x762 PF: > { %s4424_s8 = sld [smem:[#allocation22_spill]]  ;;  %s4425_s20 = sld [smem:[#allocation19_spill]] }
 0x763   : > { %s4426_s18 = sld [smem:[#allocation26_spill]] }
 0x768   : > { %p3256_p5 = scmp.ge.s32.totalorder %s4424_s8, 2  ;;  %s2321_s24 = sand.u32 1, %s4425_s20  }
 0x769   : > { %p4427_p0 = scmp.ne.s32.totalorder %s4426_s18, 0  ;;  %s2322_s19 = scalar_lea.sflag [#allocation4], %s2321_s24 }
 0x76b   : > { %p3241_p10 = pnand %p3256_p5, %p4427_p0 }
 0x76d   : > { %3556 = dma.done.wait (!%p3241_p10), %s2322_s19, 1024  }
 0x76e   : > { %3558 = vsyncadd (!%p3241_p10), %s2322_s19, 4294966272  ;;  %s4428_s30 = sld [smem:[#allocation23_spill]]  ;;  %s4429_s27 = sld [smem:[#allocation20_spill]] }
 0x76f   : > { %s4430_s28 = sld [smem:[#allocation21_spill]]  ;;  %s4431_s29 = sld [smem:[#allocation24_spill]] }
 0x774   : > { %p32_p2 = scmp.ge.s32.totalorder %s4428_s30, 4  }
 0x776   :  { %34 = sbr.rel (!%p32_p2) target bundleno = 16 (0x10), region = 152 }
 0x77d   :  { %2327 = vsyncpa [#allocation3], 1 }
 0x77e   :  { %2329 = vsyncpa [#allocation3 + $0x1], 1 }
 0x77f   :  { %2330 = vsyncpa [#allocation6], 1 }
 0x780   :  { %2331 = vsyncpa [#allocation9], 1 }
 0x781   :  { %2332 = vsyncpa [#allocation12], 1 }
 0x782   :  { %2333 = vsyncpa [#allocation4], 1 }
 0x783   :  { %2335 = vsyncpa [#allocation4 + $0x1], 1 }

</bundles_post_ra>
